<compile_context>
chip_gen: v5e
topology: v5e:2x2
jax: 0.10.0
libtpu: 0.0.40
codegen_flags: <defaults>
</compile_context>

<pallas_src>
import functools

import numpy as np
import jax
import jax.numpy as jnp
from jax.experimental import pallas as pl
from jax.experimental.pallas import tpu as pltpu

_EPS = 1e-5  # BatchNorm2d eps


# ---------------------------------------------------------------------------
# Fused Pallas kernel: one batch element per grid step
# ---------------------------------------------------------------------------
def _decoder_kernel(xd_ref, skip_ref, mask_ref,
                    wt_ref, bt_ref, w1_ref, s1_ref, b1_ref,
                    w2_ref, s2_ref, b2_ref,
                    o_ref, cat_ref, y1_ref,
                    *, cout, wrow, lp, kt):
    """Whole Decoder_Block forward for one image, on flat row-padded slabs.

    Layout: an image with R rows lives in a (C, L) slab, pixel (r, c) at flat
    index  base + r*wrow + c  (wrow >= image width; extra columns are junk).
    With that layout a conv tap shift (di, dj) is the static lane slice
    [di*wrow + dj : di*wrow + dj + lp], so each conv collapses to
    im2col-concat (in VMEM) + a single MXU matmul.
    """
    m0 = wrow + 1                        # data offset inside cat/y1 scratch
    valid = mask_ref[...] > 0.5          # (1, lp): 1 on the interior pixels

    # Margins of the scratch slabs are never read for valid outputs, but zero
    # them so junk positions stay finite before they get masked away.
    cat_ref[...] = jnp.zeros_like(cat_ref)
    y1_ref[...] = jnp.zeros_like(y1_ref)

    def conv(src, w_mat, taps_1d):
        cols = [src(di * wrow + dj)
                for di in range(taps_1d) for dj in range(taps_1d)]
        im2col = jnp.concatenate(cols, axis=0).astype(jnp.bfloat16)
        return jnp.dot(w_mat.astype(jnp.bfloat16), im2col,
                       preferred_element_type=jnp.float32)

    # ---- ConvTranspose2d(k, s=2): ONE matmul with K = k*k*Cin on the
    #      zero-dilated, padded input slab built by the wrapper. ------------
    up = conv(lambda o: xd_ref[0, :, o:o + lp], wt_ref[...], kt)
    up = jnp.where(valid, up + bt_ref[...], 0.0)                 # (Cout, lp)

    # ---- implicit torch.cat((skip, up), dim=1): disjoint channel rows -----
    cat_ref[0:cout, m0:m0 + lp] = skip_ref[0]
    cat_ref[cout:2 * cout, m0:m0 + lp] = up
    # Dropout2d(p=0.3) is the identity in inference mode.

    # ---- DoubleConv layer 1: 3x3 conv (K = 9*2*Cout) + folded BN + ReLU ---
    y = conv(lambda o: cat_ref[:, o:o + lp], w1_ref[...], 3)
    y = jnp.maximum(y * s1_ref[...] + b1_ref[...], 0.0)
    y1_ref[:, m0:m0 + lp] = jnp.where(valid, y, 0.0)

    # ---- DoubleConv layer 2: 3x3 conv (K = 9*Cout) + folded BN + ReLU -----
    z = conv(lambda o: y1_ref[:, o:o + lp], w2_ref[...], 3)
    z = jnp.maximum(z * s2_ref[...] + b2_ref[...], 0.0)
    o_ref[0] = jnp.where(valid, z, 0.0).astype(o_ref.dtype)


# ---------------------------------------------------------------------------
# Parameters (deterministic, shapes as in the PyTorch __init__)
# ---------------------------------------------------------------------------
def init_params(key, in_channels, out_channels, kt=4):
    ks = jax.random.split(key, 12)
    std_dc = float(np.sqrt(2.0 / 9.0 * in_channels))   # DoubleConv init std
    f32 = jnp.float32
    return dict(
        # nn.ConvTranspose2d(in, out, 4, 2): weight (Cin,Cout,4,4), bias (Cout,)
        wt=0.1 * jax.random.normal(ks[0], (in_channels, out_channels, kt, kt), f32),
        bt=0.1 * jax.random.normal(ks[1], (out_channels,), f32),
        # DoubleConv conv1 (Cout, Cin, 3, 3) + BatchNorm2d(Cout) params/stats
        w1=std_dc * jax.random.normal(ks[2], (out_channels, in_channels, 3, 3), f32),
        g1=1.0 + 0.1 * jax.random.normal(ks[3], (out_channels,), f32),
        be1=0.1 * jax.random.normal(ks[4], (out_channels,), f32),
        rm1=0.1 * jax.random.normal(ks[5], (out_channels,), f32),
        rv1=1.0 + 0.5 * jax.random.uniform(ks[6], (out_channels,), f32),
        # DoubleConv conv2 (Cout, Cout, 3, 3) + BatchNorm2d(Cout)
        w2=std_dc * jax.random.normal(ks[7], (out_channels, out_channels, 3, 3), f32),
        g2=1.0 + 0.1 * jax.random.normal(ks[8], (out_channels,), f32),
        be2=0.1 * jax.random.normal(ks[9], (out_channels,), f32),
        rm2=0.1 * jax.random.normal(ks[10], (out_channels,), f32),
        rv2=1.0 + 0.5 * jax.random.uniform(ks[11], (out_channels,), f32),
    )


def _bn_fold(gamma, beta, rmean, rvar):
    scale = gamma / jnp.sqrt(rvar + _EPS)
    return scale, beta - rmean * scale


# ---------------------------------------------------------------------------
# Decoder_Block.forward
# ---------------------------------------------------------------------------
def decoder_block_forward(params, x, skip, *, stride=2):
    n, cin, h, w = x.shape
    cout = params["wt"].shape[1]
    kt = params["wt"].shape[2]
    assert cin == 2 * cout, "U-Net decoder: in_channels == 2*out_channels"

    ho = (h - 1) * stride + kt            # ConvTranspose2d output size
    wo = (w - 1) * stride + kt
    # TODO(synk): TF.resize (bilinear) fallback for mismatched shapes is not
    # implemented; inputs must satisfy up.shape == skip.shape.
    assert skip.shape == (n, cout, ho, wo), (skip.shape, (n, cout, ho, wo))

    hp = ho + 2                           # 3x3-conv padded grid height
    # Flat row width: >= dilated-input width (wo + kt - 1); picked so the
    # (hp * wrow) output slab is a multiple of 128 lanes when possible.
    wmin = wo + kt - 1
    wrow = next((c for c in range(wmin, wmin + 128) if (hp * c) % 128 == 0),
                wmin)
    lp = hp * wrow                        # flat length of one padded image
    lb = lp + 3 * wrow                    # scratch slab length (>= lp+2*wrow+2)
    lx = lp + 4 * wrow                    # upsample-input slab (>= lp+3*wrow+3)
    m0 = wrow + 1                         # data offset inside the slabs
    f32 = jnp.float32

    # --- zero-dilated + padded ConvTranspose input, laid out flat ----------
    # TODO(synk): the stride-2 phase decomposition (4 sub-convs, no inserted
    # zeros) would cut this step's FLOPs/bytes ~4x; kept as dilation here.
    hd = (h - 1) * stride + 1
    hx = hd + 2 * (kt - 1)                # rows/cols of dilated+padded image
    xd = jnp.zeros((n, cin, hd, hd), f32).at[:, :, ::stride, ::stride].set(x)
    xd = jnp.pad(xd, ((0, 0), (0, 0), (kt - 1, kt - 1),
                      (kt - 1, wrow - hd - (kt - 1))))
    xd_full = jnp.pad(xd.reshape(n, cin, hx * wrow),
                      ((0, 0), (0, 0), (m0, lx - m0 - hx * wrow)))

    # --- skip connection placed on the zero-padded (hp x wrow) grid --------
    skip_flat = jnp.pad(skip, ((0, 0), (0, 0), (1, 1),
                               (1, wrow - wo - 1))).reshape(n, cout, lp)

    # --- interior mask (1 inside the ho x wo valid region) -----------------
    mask = jnp.zeros((hp, wrow), f32).at[1:1 + ho, 1:1 + wo].set(1.0)
    mask = mask.reshape(1, lp)

    # --- fold weights into single-matmul layouts ----------------------------
    wt_flip = params["wt"][:, :, ::-1, ::-1]                  # (Cin,Cout,kt,kt)
    wt_mat = jnp.transpose(wt_flip, (1, 2, 3, 0)).reshape(cout, kt * kt * cin)
    bt = params["bt"].reshape(cout, 1)
    s1, b1 = _bn_fold(params["g1"], params["be1"], params["rm1"], params["rv1"])
    w1_mat = jnp.transpose(params["w1"], (0, 2, 3, 1)).reshape(cout, 9 * cin)
    s2, b2 = _bn_fold(params["g2"], params["be2"], params["rm2"], params["rv2"])
    w2_mat = jnp.transpose(params["w2"], (0, 2, 3, 1)).reshape(cout, 9 * cout)

    kernel = functools.partial(_decoder_kernel, cout=cout, wrow=wrow,
                               lp=lp, kt=kt)
    out_flat = pl.pallas_call(
        kernel,
        out_shape=jax.ShapeDtypeStruct((n, cout, lp), f32),
        grid=(n,),
        in_specs=[
            pl.BlockSpec((1, cin, lx), lambda b: (b, 0, 0)),     # dilated x
            pl.BlockSpec((1, cout, lp), lambda b: (b, 0, 0)),    # skip
            pl.BlockSpec((1, lp), lambda b: (0, 0)),             # interior mask
            pl.BlockSpec((cout, kt * kt * cin), lambda b: (0, 0)),
            pl.BlockSpec((cout, 1), lambda b: (0, 0)),
            pl.BlockSpec((cout, 9 * cin), lambda b: (0, 0)),
            pl.BlockSpec((cout, 1), lambda b: (0, 0)),
            pl.BlockSpec((cout, 1), lambda b: (0, 0)),
            pl.BlockSpec((cout, 9 * cout), lambda b: (0, 0)),
            pl.BlockSpec((cout, 1), lambda b: (0, 0)),
            pl.BlockSpec((cout, 1), lambda b: (0, 0)),
        ],
        out_specs=pl.BlockSpec((1, cout, lp), lambda b: (b, 0, 0)),
        scratch_shapes=[pltpu.VMEM((2 * cout, lb), f32),   # cat(skip, up) slab
                        pltpu.VMEM((cout, lb), f32)],      # conv1 output slab
        compiler_params=pltpu.CompilerParams(
            dimension_semantics=("parallel",)),
    )(xd_full, skip_flat, mask, wt_mat, bt, w1_mat,
      s1.reshape(cout, 1), b1.reshape(cout, 1), w2_mat,
      s2.reshape(cout, 1), b2.reshape(cout, 1))

    out = out_flat.reshape(n, cout, hp, wrow)[:, :, 1:1 + ho, 1:1 + wo]
    return out


# ---------------------------------------------------------------------------
# Pure-XLA reference (for correctness check)
# ---------------------------------------------------------------------------
def reference_forward(params, x, skip):
    dn = ("NCHW", "OIHW", "NCHW")
    prec = jax.lax.Precision.HIGHEST
    kt = params["wt"].shape[2]
    wt_oihw = jnp.transpose(params["wt"], (1, 0, 2, 3))[:, :, ::-1, ::-1]
    up = jax.lax.conv_general_dilated(
        x, wt_oihw, window_strides=(1, 1),
        padding=[(kt - 1, kt - 1), (kt - 1, kt - 1)], lhs_dilation=(2, 2),
        dimension_numbers=dn, precision=prec)
    up = up + params["bt"][None, :, None, None]
    cat = jnp.concatenate([skip, up], axis=1)

    def conv_bn_relu(hh, wc, g, be, rm, rv):
        hh = jax.lax.conv_general_dilated(
            hh, wc, window_strides=(1, 1), padding=[(1, 1), (1, 1)],
            dimension_numbers=dn, precision=prec)
        s = g / jnp.sqrt(rv + _EPS)
        b = be - rm * s
        return jnp.maximum(hh * s[None, :, None, None] + b[None, :, None, None],
                           0.0)

    hh = conv_bn_relu(cat, params["w1"], params["g1"], params["be1"],
                      params["rm1"], params["rv1"])
    hh = conv_bn_relu(hh, params["w2"], params["g2"], params["be2"],
                      params["rm2"], params["rv2"])
    return hh


if __name__ == "__main__":
    key = jax.random.PRNGKey(0)
    k_x, k_skip, k_p = jax.random.split(key, 3)

    in_channels, out_channels = 8, 4   # U-Net decoder: in_channels == 2*out
    N, H, W = 2, 8, 8
    x = jax.random.normal(k_x, (N, in_channels, H, W), jnp.float32)
    # ConvTranspose2d(k=4, s=2, p=0): HxW -> (2H+2)x(2W+2); skip matches it.
    skip = jax.random.normal(k_skip, (N, out_channels, 2 * H + 2, 2 * W + 2),
                             jnp.float32)
    params = init_params(k_p, in_channels, out_channels)

    fwd = jax.jit(decoder_block_forward)
    out = jax.block_until_ready(fwd(params, x, skip))
    assert out.shape == (N, out_channels, 2 * H + 2, 2 * W + 2), out.shape

    ref = reference_forward(params, x, skip)
    # Tolerance budget: matmul operands are rounded to bf16 on the MXU inside
    # the kernel (f32 accumulation); reference is full-f32.  Output std here
    # is ~40, estimated elementwise error std ~0.3.
    np.testing.assert_allclose(np.asarray(out), np.asarray(ref),
                               rtol=2e-2, atol=2e0)
    print("KERNEL_OK")
</pallas_src>

<mosaic_0001>
module attributes {stable_mosaic.version = 11 : i64} {
  func.func @_decoder_kernel(%arg0: i32, %arg1: memref<1x8x768xf32, #tpu.memory_space<vmem>>, %arg2: memref<1x4x640xf32, #tpu.memory_space<vmem>>, %arg3: memref<1x640xf32, #tpu.memory_space<vmem>>, %arg4: memref<4x128xf32, #tpu.memory_space<vmem>>, %arg5: memref<4x1xf32, #tpu.memory_space<vmem>>, %arg6: memref<4x72xf32, #tpu.memory_space<vmem>>, %arg7: memref<4x1xf32, #tpu.memory_space<vmem>>, %arg8: memref<4x1xf32, #tpu.memory_space<vmem>>, %arg9: memref<4x36xf32, #tpu.memory_space<vmem>>, %arg10: memref<4x1xf32, #tpu.memory_space<vmem>>, %arg11: memref<4x1xf32, #tpu.memory_space<vmem>>, %arg12: memref<1x4x640xf32, #tpu.memory_space<vmem>>, %arg13: memref<8x736xf32, #tpu.memory_space<vmem>>, %arg14: memref<4x736xf32, #tpu.memory_space<vmem>>) attributes {dimension_semantics = [#tpu.dimension_semantics<parallel>], iteration_bounds = array<i64: 2>, scalar_prefetch = 0 : i64, scratch_operands = 2 : i64, tpu.core_type = #tpu.core_type<tc>, window_params = [{transform_indices = @transform_0, window_bounds = array<i64: 1, 8, 768>}, {transform_indices = @transform_1, window_bounds = array<i64: 1, 4, 640>}, {pipeline_mode = #tpu.pipeline_mode<synchronous>, transform_indices = @transform_2, window_bounds = array<i64: 1, 640>}, {pipeline_mode = #tpu.pipeline_mode<synchronous>, transform_indices = @transform_3, window_bounds = array<i64: 4, 128>}, {pipeline_mode = #tpu.pipeline_mode<synchronous>, transform_indices = @transform_4, window_bounds = array<i64: 4, 1>}, {pipeline_mode = #tpu.pipeline_mode<synchronous>, transform_indices = @transform_5, window_bounds = array<i64: 4, 72>}, {pipeline_mode = #tpu.pipeline_mode<synchronous>, transform_indices = @transform_6, window_bounds = array<i64: 4, 1>}, {pipeline_mode = #tpu.pipeline_mode<synchronous>, transform_indices = @transform_7, window_bounds = array<i64: 4, 1>}, {pipeline_mode = #tpu.pipeline_mode<synchronous>, transform_indices = @transform_8, window_bounds = array<i64: 4, 36>}, {pipeline_mode = #tpu.pipeline_mode<synchronous>, transform_indices = @transform_9, window_bounds = array<i64: 4, 1>}, {pipeline_mode = #tpu.pipeline_mode<synchronous>, transform_indices = @transform_10, window_bounds = array<i64: 4, 1>}, {transform_indices = @transform_11, window_bounds = array<i64: 1, 4, 640>}]} {
    %c0 = arith.constant 0 : index
    %c0_0 = arith.constant 0 : index
    %0 = vector.load %arg3[%c0, %c0_0] : memref<1x640xf32, #tpu.memory_space<vmem>>, vector<1x640xf32>
    %cst = arith.constant 5.000000e-01 : f32
    %1 = vector.broadcast %cst : f32 to vector<1x640xf32>
    %2 = arith.cmpf ogt, %0, %1 : vector<1x640xf32>
    %cst_1 = arith.constant 0.000000e+00 : f32
    %3 = vector.broadcast %cst_1 : f32 to vector<8x736xf32>
    %c0_2 = arith.constant 0 : index
    %c0_3 = arith.constant 0 : index
    %4 = vector.load %arg13[%c0_2, %c0_3] : memref<8x736xf32, #tpu.memory_space<vmem>>, vector<8x736xf32>
    tpu.vector_store %arg13[%c0_2, %c0_3], %3 {strides = array<i32>} : memref<8x736xf32, #tpu.memory_space<vmem>>, vector<8x736xf32>,
    %cst_4 = arith.constant 0.000000e+00 : f32
    %5 = vector.broadcast %cst_4 : f32 to vector<4x736xf32>
    %c0_5 = arith.constant 0 : index
    %c0_6 = arith.constant 0 : index
    %6 = vector.load %arg14[%c0_5, %c0_6] : memref<4x736xf32, #tpu.memory_space<vmem>>, vector<4x736xf32>
    tpu.vector_store %arg14[%c0_5, %c0_6], %5 {strides = array<i32>} : memref<4x736xf32, #tpu.memory_space<vmem>>, vector<4x736xf32>,
    %c0_7 = arith.constant 0 : index
    %c0_8 = arith.constant 0 : index
    %7 = vector.load %arg4[%c0_7, %c0_8] : memref<4x128xf32, #tpu.memory_space<vmem>>, vector<4x128xf32>
    %c0_9 = arith.constant 0 : index
    %c0_10 = arith.constant 0 : index
    %c0_11 = arith.constant 0 : index
    %8 = vector.load %arg1[%c0_9, %c0_10, %c0_11] : memref<1x8x768xf32, #tpu.memory_space<vmem>>, vector<1x8x640xf32>
    %9 = vector.shape_cast %8 : vector<1x8x640xf32> to vector<8x640xf32>
    %c0_12 = arith.constant 0 : index
    %c0_13 = arith.constant 0 : index
    %c1 = arith.constant 1 : index
    %10 = vector.load %arg1[%c0_12, %c0_13, %c1] : memref<1x8x768xf32, #tpu.memory_space<vmem>>, vector<1x8x640xf32>
    %11 = vector.shape_cast %10 : vector<1x8x640xf32> to vector<8x640xf32>
    %c0_14 = arith.constant 0 : index
    %c0_15 = arith.constant 0 : index
    %c2 = arith.constant 2 : index
    %12 = vector.load %arg1[%c0_14, %c0_15, %c2] : memref<1x8x768xf32, #tpu.memory_space<vmem>>, vector<1x8x640xf32>
    %13 = vector.shape_cast %12 : vector<1x8x640xf32> to vector<8x640xf32>
    %c0_16 = arith.constant 0 : index
    %c0_17 = arith.constant 0 : index
    %c3 = arith.constant 3 : index
    %14 = vector.load %arg1[%c0_16, %c0_17, %c3] : memref<1x8x768xf32, #tpu.memory_space<vmem>>, vector<1x8x640xf32>
    %15 = vector.shape_cast %14 : vector<1x8x640xf32> to vector<8x640xf32>
    %c0_18 = arith.constant 0 : index
    %c0_19 = arith.constant 0 : index
    %c32 = arith.constant 32 : index
    %16 = vector.load %arg1[%c0_18, %c0_19, %c32] : memref<1x8x768xf32, #tpu.memory_space<vmem>>, vector<1x8x640xf32>
    %17 = vector.shape_cast %16 : vector<1x8x640xf32> to vector<8x640xf32>
    %c0_20 = arith.constant 0 : index
    %c0_21 = arith.constant 0 : index
    %c33 = arith.constant 33 : index
    %18 = vector.load %arg1[%c0_20, %c0_21, %c33] : memref<1x8x768xf32, #tpu.memory_space<vmem>>, vector<1x8x640xf32>
    %19 = vector.shape_cast %18 : vector<1x8x640xf32> to vector<8x640xf32>
    %c0_22 = arith.constant 0 : index
    %c0_23 = arith.constant 0 : index
    %c34 = arith.constant 34 : index
    %20 = vector.load %arg1[%c0_22, %c0_23, %c34] : memref<1x8x768xf32, #tpu.memory_space<vmem>>, vector<1x8x640xf32>
    %21 = vector.shape_cast %20 : vector<1x8x640xf32> to vector<8x640xf32>
    %c0_24 = arith.constant 0 : index
    %c0_25 = arith.constant 0 : index
    %c35 = arith.constant 35 : index
    %22 = vector.load %arg1[%c0_24, %c0_25, %c35] : memref<1x8x768xf32, #tpu.memory_space<vmem>>, vector<1x8x640xf32>
    %23 = vector.shape_cast %22 : vector<1x8x640xf32> to vector<8x640xf32>
    %c0_26 = arith.constant 0 : index
    %c0_27 = arith.constant 0 : index
    %c64 = arith.constant 64 : index
    %24 = vector.load %arg1[%c0_26, %c0_27, %c64] : memref<1x8x768xf32, #tpu.memory_space<vmem>>, vector<1x8x640xf32>
    %25 = vector.shape_cast %24 : vector<1x8x640xf32> to vector<8x640xf32>
    %c0_28 = arith.constant 0 : index
    %c0_29 = arith.constant 0 : index
    %c65 = arith.constant 65 : index
    %26 = vector.load %arg1[%c0_28, %c0_29, %c65] : memref<1x8x768xf32, #tpu.memory_space<vmem>>, vector<1x8x640xf32>
    %27 = vector.shape_cast %26 : vector<1x8x640xf32> to vector<8x640xf32>
    %c0_30 = arith.constant 0 : index
    %c0_31 = arith.constant 0 : index
    %c66 = arith.constant 66 : index
    %28 = vector.load %arg1[%c0_30, %c0_31, %c66] : memref<1x8x768xf32, #tpu.memory_space<vmem>>, vector<1x8x640xf32>
    %29 = vector.shape_cast %28 : vector<1x8x640xf32> to vector<8x640xf32>
    %c0_32 = arith.constant 0 : index
    %c0_33 = arith.constant 0 : index
    %c67 = arith.constant 67 : index
    %30 = vector.load %arg1[%c0_32, %c0_33, %c67] : memref<1x8x768xf32, #tpu.memory_space<vmem>>, vector<1x8x640xf32>
    %31 = vector.shape_cast %30 : vector<1x8x640xf32> to vector<8x640xf32>
    %c0_34 = arith.constant 0 : index
    %c0_35 = arith.constant 0 : index
    %c96 = arith.constant 96 : index
    %32 = vector.load %arg1[%c0_34, %c0_35, %c96] : memref<1x8x768xf32, #tpu.memory_space<vmem>>, vector<1x8x640xf32>
    %33 = vector.shape_cast %32 : vector<1x8x640xf32> to vector<8x640xf32>
    %c0_36 = arith.constant 0 : index
    %c0_37 = arith.constant 0 : index
    %c97 = arith.constant 97 : index
    %34 = vector.load %arg1[%c0_36, %c0_37, %c97] : memref<1x8x768xf32, #tpu.memory_space<vmem>>, vector<1x8x640xf32>
    %35 = vector.shape_cast %34 : vector<1x8x640xf32> to vector<8x640xf32>
    %c0_38 = arith.constant 0 : index
    %c0_39 = arith.constant 0 : index
    %c98 = arith.constant 98 : index
    %36 = vector.load %arg1[%c0_38, %c0_39, %c98] : memref<1x8x768xf32, #tpu.memory_space<vmem>>, vector<1x8x640xf32>
    %37 = vector.shape_cast %36 : vector<1x8x640xf32> to vector<8x640xf32>
    %c0_40 = arith.constant 0 : index
    %c0_41 = arith.constant 0 : index
    %c99 = arith.constant 99 : index
    %38 = vector.load %arg1[%c0_40, %c0_41, %c99] : memref<1x8x768xf32, #tpu.memory_space<vmem>>, vector<1x8x640xf32>
    %39 = vector.shape_cast %38 : vector<1x8x640xf32> to vector<8x640xf32>
    %40 = tpu.concatenate %9, %11, %13, %15, %17, %19, %21, %23, %25, %27, %29, %31, %33, %35, %37, %39 in 0 : vector<8x640xf32>, vector<8x640xf32>, vector<8x640xf32>, vector<8x640xf32>, vector<8x640xf32>, vector<8x640xf32>, vector<8x640xf32>, vector<8x640xf32>, vector<8x640xf32>, vector<8x640xf32>, vector<8x640xf32>, vector<8x640xf32>, vector<8x640xf32>, vector<8x640xf32>, vector<8x640xf32>, vector<8x640xf32> -> vector<128x640xf32>
    %41 = arith.truncf %40 : vector<128x640xf32> to vector<128x640xbf16>
    %42 = arith.truncf %7 : vector<4x128xf32> to vector<4x128xbf16>
    %cst_42 = arith.constant dense<0.000000e+00> : vector<4x640xf32>
    %43 = tpu.matmul %42, %41, %cst_42 {dimension_numbers = #tpu.dot_dimension_numbers<[1], [0], [0], [1], [0, 0, 1, 1], [], []>} : vector<4x128xbf16>, vector<128x640xbf16>, vector<4x640xf32> -> vector<4x640xf32>
    %c0_43 = arith.constant 0 : index
    %c0_44 = arith.constant 0 : index
    %44 = vector.load %arg5[%c0_43, %c0_44] : memref<4x1xf32, #tpu.memory_space<vmem>>, vector<4x1xf32>
    %45 = vector.broadcast %44 : vector<4x1xf32> to vector<4x640xf32>
    %46 = arith.addf %43, %45 : vector<4x640xf32>
    %cst_45 = arith.constant 0.000000e+00 : f32
    %47 = vector.shape_cast %2 : vector<1x640xi1> to vector<1x640xi1>
    %48 = vector.broadcast %47 : vector<1x640xi1> to vector<4x640xi1>
    %49 = vector.broadcast %cst_45 : f32 to vector<4x640xf32>
    %50 = arith.select %48, %46, %49 : vector<4x640xi1>, vector<4x640xf32>
    %c0_46 = arith.constant 0 : index
    %c0_47 = arith.constant 0 : index
    %c0_48 = arith.constant 0 : index
    %51 = vector.load %arg2[%c0_46, %c0_47, %c0_48] : memref<1x4x640xf32, #tpu.memory_space<vmem>>, vector<1x4x640xf32>
    %52 = vector.shape_cast %51 : vector<1x4x640xf32> to vector<4x640xf32>
    %c0_49 = arith.constant 0 : index
    %c33_50 = arith.constant 33 : index
    %53 = vector.load %arg13[%c0_49, %c33_50] : memref<8x736xf32, #tpu.memory_space<vmem>>, vector<4x640xf32>
    tpu.vector_store %arg13[%c0_49, %c33_50], %52 {strides = array<i32>} : memref<8x736xf32, #tpu.memory_space<vmem>>, vector<4x640xf32>,
    %c4 = arith.constant 4 : index
    %c33_51 = arith.constant 33 : index
    %54 = vector.load %arg13[%c4, %c33_51] : memref<8x736xf32, #tpu.memory_space<vmem>>, vector<4x640xf32>
    tpu.vector_store %arg13[%c4, %c33_51], %50 {strides = array<i32>} : memref<8x736xf32, #tpu.memory_space<vmem>>, vector<4x640xf32>,
    %c0_52 = arith.constant 0 : index
    %c0_53 = arith.constant 0 : index
    %55 = vector.load %arg6[%c0_52, %c0_53] : memref<4x72xf32, #tpu.memory_space<vmem>>, vector<4x72xf32>
    %c0_54 = arith.constant 0 : index
    %c0_55 = arith.constant 0 : index
    %56 = vector.load %arg13[%c0_54, %c0_55] : memref<8x736xf32, #tpu.memory_space<vmem>>, vector<8x640xf32>
    %c0_56 = arith.constant 0 : index
    %c1_57 = arith.constant 1 : index
    %57 = vector.load %arg13[%c0_56, %c1_57] : memref<8x736xf32, #tpu.memory_space<vmem>>, vector<8x640xf32>
    %c0_58 = arith.constant 0 : index
    %c2_59 = arith.constant 2 : index
    %58 = vector.load %arg13[%c0_58, %c2_59] : memref<8x736xf32, #tpu.memory_space<vmem>>, vector<8x640xf32>
    %c0_60 = arith.constant 0 : index
    %c32_61 = arith.constant 32 : index
    %59 = vector.load %arg13[%c0_60, %c32_61] : memref<8x736xf32, #tpu.memory_space<vmem>>, vector<8x640xf32>
    %c0_62 = arith.constant 0 : index
    %c33_63 = arith.constant 33 : index
    %60 = vector.load %arg13[%c0_62, %c33_63] : memref<8x736xf32, #tpu.memory_space<vmem>>, vector<8x640xf32>
    %c0_64 = arith.constant 0 : index
    %c34_65 = arith.constant 34 : index
    %61 = vector.load %arg13[%c0_64, %c34_65] : memref<8x736xf32, #tpu.memory_space<vmem>>, vector<8x640xf32>
    %c0_66 = arith.constant 0 : index
    %c64_67 = arith.constant 64 : index
    %62 = vector.load %arg13[%c0_66, %c64_67] : memref<8x736xf32, #tpu.memory_space<vmem>>, vector<8x640xf32>
    %c0_68 = arith.constant 0 : index
    %c65_69 = arith.constant 65 : index
    %63 = vector.load %arg13[%c0_68, %c65_69] : memref<8x736xf32, #tpu.memory_space<vmem>>, vector<8x640xf32>
    %c0_70 = arith.constant 0 : index
    %c66_71 = arith.constant 66 : index
    %64 = vector.load %arg13[%c0_70, %c66_71] : memref<8x736xf32, #tpu.memory_space<vmem>>, vector<8x640xf32>
    %65 = tpu.concatenate %56, %57, %58, %59, %60, %61, %62, %63, %64 in 0 : vector<8x640xf32>, vector<8x640xf32>, vector<8x640xf32>, vector<8x640xf32>, vector<8x640xf32>, vector<8x640xf32>, vector<8x640xf32>, vector<8x640xf32>, vector<8x640xf32> -> vector<72x640xf32>
    %66 = arith.truncf %65 : vector<72x640xf32> to vector<72x640xbf16>
    %67 = arith.truncf %55 : vector<4x72xf32> to vector<4x72xbf16>
    %cst_72 = arith.constant dense<0.000000e+00> : vector<4x640xf32>
    %68 = tpu.matmul %67, %66, %cst_72 {dimension_numbers = #tpu.dot_dimension_numbers<[1], [0], [0], [1], [0, 0, 1, 1], [], []>} : vector<4x72xbf16>, vector<72x640xbf16>, vector<4x640xf32> -> vector<4x640xf32>
    %c0_73 = arith.constant 0 : index
    %c0_74 = arith.constant 0 : index
    %69 = vector.load %arg7[%c0_73, %c0_74] : memref<4x1xf32, #tpu.memory_space<vmem>>, vector<4x1xf32>
    %70 = vector.broadcast %69 : vector<4x1xf32> to vector<4x640xf32>
    %71 = arith.mulf %68, %70 : vector<4x640xf32>
    %c0_75 = arith.constant 0 : index
    %c0_76 = arith.constant 0 : index
    %72 = vector.load %arg8[%c0_75, %c0_76] : memref<4x1xf32, #tpu.memory_space<vmem>>, vector<4x1xf32>
    %73 = vector.broadcast %72 : vector<4x1xf32> to vector<4x640xf32>
    %74 = arith.addf %71, %73 : vector<4x640xf32>
    %cst_77 = arith.constant 0.000000e+00 : f32
    %75 = vector.broadcast %cst_77 : f32 to vector<4x640xf32>
    %76 = arith.maximumf %74, %75 : vector<4x640xf32>
    %cst_78 = arith.constant 0.000000e+00 : f32
    %77 = vector.shape_cast %2 : vector<1x640xi1> to vector<1x640xi1>
    %78 = vector.broadcast %77 : vector<1x640xi1> to vector<4x640xi1>
    %79 = vector.broadcast %cst_78 : f32 to vector<4x640xf32>
    %80 = arith.select %78, %76, %79 : vector<4x640xi1>, vector<4x640xf32>
    %c0_79 = arith.constant 0 : index
    %c33_80 = arith.constant 33 : index
    %81 = vector.load %arg14[%c0_79, %c33_80] : memref<4x736xf32, #tpu.memory_space<vmem>>, vector<4x640xf32>
    tpu.vector_store %arg14[%c0_79, %c33_80], %80 {strides = array<i32>} : memref<4x736xf32, #tpu.memory_space<vmem>>, vector<4x640xf32>,
    %c0_81 = arith.constant 0 : index
    %c0_82 = arith.constant 0 : index
    %82 = vector.load %arg9[%c0_81, %c0_82] : memref<4x36xf32, #tpu.memory_space<vmem>>, vector<4x36xf32>
    %c0_83 = arith.constant 0 : index
    %c0_84 = arith.constant 0 : index
    %83 = vector.load %arg14[%c0_83, %c0_84] : memref<4x736xf32, #tpu.memory_space<vmem>>, vector<4x640xf32>
    %c0_85 = arith.constant 0 : index
    %c1_86 = arith.constant 1 : index
    %84 = vector.load %arg14[%c0_85, %c1_86] : memref<4x736xf32, #tpu.memory_space<vmem>>, vector<4x640xf32>
    %c0_87 = arith.constant 0 : index
    %c2_88 = arith.constant 2 : index
    %85 = vector.load %arg14[%c0_87, %c2_88] : memref<4x736xf32, #tpu.memory_space<vmem>>, vector<4x640xf32>
    %c0_89 = arith.constant 0 : index
    %c32_90 = arith.constant 32 : index
    %86 = vector.load %arg14[%c0_89, %c32_90] : memref<4x736xf32, #tpu.memory_space<vmem>>, vector<4x640xf32>
    %c0_91 = arith.constant 0 : index
    %c33_92 = arith.constant 33 : index
    %87 = vector.load %arg14[%c0_91, %c33_92] : memref<4x736xf32, #tpu.memory_space<vmem>>, vector<4x640xf32>
    %c0_93 = arith.constant 0 : index
    %c34_94 = arith.constant 34 : index
    %88 = vector.load %arg14[%c0_93, %c34_94] : memref<4x736xf32, #tpu.memory_space<vmem>>, vector<4x640xf32>
    %c0_95 = arith.constant 0 : index
    %c64_96 = arith.constant 64 : index
    %89 = vector.load %arg14[%c0_95, %c64_96] : memref<4x736xf32, #tpu.memory_space<vmem>>, vector<4x640xf32>
    %c0_97 = arith.constant 0 : index
    %c65_98 = arith.constant 65 : index
    %90 = vector.load %arg14[%c0_97, %c65_98] : memref<4x736xf32, #tpu.memory_space<vmem>>, vector<4x640xf32>
    %c0_99 = arith.constant 0 : index
    %c66_100 = arith.constant 66 : index
    %91 = vector.load %arg14[%c0_99, %c66_100] : memref<4x736xf32, #tpu.memory_space<vmem>>, vector<4x640xf32>
    %92 = tpu.concatenate %83, %84, %85, %86, %87, %88, %89, %90, %91 in 0 : vector<4x640xf32>, vector<4x640xf32>, vector<4x640xf32>, vector<4x640xf32>, vector<4x640xf32>, vector<4x640xf32>, vector<4x640xf32>, vector<4x640xf32>, vector<4x640xf32> -> vector<36x640xf32>
    %93 = arith.truncf %92 : vector<36x640xf32> to vector<36x640xbf16>
    %94 = arith.truncf %82 : vector<4x36xf32> to vector<4x36xbf16>
    %cst_101 = arith.constant dense<0.000000e+00> : vector<4x640xf32>
    %95 = tpu.matmul %94, %93, %cst_101 {dimension_numbers = #tpu.dot_dimension_numbers<[1], [0], [0], [1], [0, 0, 1, 1], [], []>} : vector<4x36xbf16>, vector<36x640xbf16>, vector<4x640xf32> -> vector<4x640xf32>
    %c0_102 = arith.constant 0 : index
    %c0_103 = arith.constant 0 : index
    %96 = vector.load %arg10[%c0_102, %c0_103] : memref<4x1xf32, #tpu.memory_space<vmem>>, vector<4x1xf32>
    %97 = vector.broadcast %96 : vector<4x1xf32> to vector<4x640xf32>
    %98 = arith.mulf %95, %97 : vector<4x640xf32>
    %c0_104 = arith.constant 0 : index
    %c0_105 = arith.constant 0 : index
    %99 = vector.load %arg11[%c0_104, %c0_105] : memref<4x1xf32, #tpu.memory_space<vmem>>, vector<4x1xf32>
    %100 = vector.broadcast %99 : vector<4x1xf32> to vector<4x640xf32>
    %101 = arith.addf %98, %100 : vector<4x640xf32>
    %cst_106 = arith.constant 0.000000e+00 : f32
    %102 = vector.broadcast %cst_106 : f32 to vector<4x640xf32>
    %103 = arith.maximumf %101, %102 : vector<4x640xf32>
    %cst_107 = arith.constant 0.000000e+00 : f32
    %104 = vector.shape_cast %2 : vector<1x640xi1> to vector<1x640xi1>
    %105 = vector.broadcast %104 : vector<1x640xi1> to vector<4x640xi1>
    %106 = vector.broadcast %cst_107 : f32 to vector<4x640xf32>
    %107 = arith.select %105, %103, %106 : vector<4x640xi1>, vector<4x640xf32>
    %c0_108 = arith.constant 0 : index
    %c0_109 = arith.constant 0 : index
    %c0_110 = arith.constant 0 : index
    %108 = vector.load %arg12[%c0_108, %c0_109, %c0_110] : memref<1x4x640xf32, #tpu.memory_space<vmem>>, vector<1x4x640xf32>
    %109 = vector.shape_cast %108 : vector<1x4x640xf32> to vector<4x640xf32>
    %110 = vector.shape_cast %107 : vector<4x640xf32> to vector<1x4x640xf32>
    tpu.vector_store %arg12[%c0_108, %c0_109, %c0_110], %110 {strides = array<i32>} : memref<1x4x640xf32, #tpu.memory_space<vmem>>, vector<1x4x640xf32>,
    return
  }
  func.func @transform_0(%arg0: i32) -> (i32, i32, i32) {
    %c0_i32 = arith.constant 0 : i32
    %c0_i32_0 = arith.constant 0 : i32
    %c0_i32_1 = arith.constant 0 : i32
    return %arg0, %c0_i32, %c0_i32_0 : i32, i32, i32
  }
  func.func @transform_1(%arg0: i32) -> (i32, i32, i32) {
    %c0_i32 = arith.constant 0 : i32
    %c0_i32_0 = arith.constant 0 : i32
    %c0_i32_1 = arith.constant 0 : i32
    return %arg0, %c0_i32, %c0_i32_0 : i32, i32, i32
  }
  func.func @transform_2(%arg0: i32) -> (i32, i32) {
    %c0_i32 = arith.constant 0 : i32
    %c0_i32_0 = arith.constant 0 : i32
    %c0_i32_1 = arith.constant 0 : i32
    return %c0_i32, %c0_i32_0 : i32, i32
  }
  func.func @transform_3(%arg0: i32) -> (i32, i32) {
    %c0_i32 = arith.constant 0 : i32
    %c0_i32_0 = arith.constant 0 : i32
    %c0_i32_1 = arith.constant 0 : i32
    return %c0_i32, %c0_i32_0 : i32, i32
  }
  func.func @transform_4(%arg0: i32) -> (i32, i32) {
    %c0_i32 = arith.constant 0 : i32
    %c0_i32_0 = arith.constant 0 : i32
    %c0_i32_1 = arith.constant 0 : i32
    return %c0_i32, %c0_i32_0 : i32, i32
  }
  func.func @transform_5(%arg0: i32) -> (i32, i32) {
    %c0_i32 = arith.constant 0 : i32
    %c0_i32_0 = arith.constant 0 : i32
    %c0_i32_1 = arith.constant 0 : i32
    return %c0_i32, %c0_i32_0 : i32, i32
  }
  func.func @transform_6(%arg0: i32) -> (i32, i32) {
    %c0_i32 = arith.constant 0 : i32
    %c0_i32_0 = arith.constant 0 : i32
    %c0_i32_1 = arith.constant 0 : i32
    return %c0_i32, %c0_i32_0 : i32, i32
  }
  func.func @transform_7(%arg0: i32) -> (i32, i32) {
    %c0_i32 = arith.constant 0 : i32
    %c0_i32_0 = arith.constant 0 : i32
    %c0_i32_1 = arith.constant 0 : i32
    return %c0_i32, %c0_i32_0 : i32, i32
  }
  func.func @transform_8(%arg0: i32) -> (i32, i32) {
    %c0_i32 = arith.constant 0 : i32
    %c0_i32_0 = arith.constant 0 : i32
    %c0_i32_1 = arith.constant 0 : i32
    return %c0_i32, %c0_i32_0 : i32, i32
  }
  func.func @transform_9(%arg0: i32) -> (i32, i32) {
    %c0_i32 = arith.constant 0 : i32
    %c0_i32_0 = arith.constant 0 : i32
    %c0_i32_1 = arith.constant 0 : i32
    return %c0_i32, %c0_i32_0 : i32, i32
  }
  func.func @transform_10(%arg0: i32) -> (i32, i32) {
    %c0_i32 = arith.constant 0 : i32
    %c0_i32_0 = arith.constant 0 : i32
    %c0_i32_1 = arith.constant 0 : i32
    return %c0_i32, %c0_i32_0 : i32, i32
  }
  func.func @transform_11(%arg0: i32) -> (i32, i32, i32) {
    %c0_i32 = arith.constant 0 : i32
    %c0_i32_0 = arith.constant 0 : i32
    %c0_i32_1 = arith.constant 0 : i32
    return %arg0, %c0_i32, %c0_i32_0 : i32, i32, i32
  }
}

</mosaic_0001>

<bundles_post_ra>
// kernel: decoder_block_forward.1
= control target key start
LH: loop header
LB: loop body
LE: loop exit
PB: predicated region body
PF: predicated region fallthrough
CT: control target
= control target key end

     0   :  { %s2455_s17 = smov 0   ;;  %s3456_s0 = inlined_call_operand.vmem [shape: f32[2,8,768], index: 0, kind: input, shape index: {}]   ;;  %s3457_s1 = inlined_call_operand.vmem [shape: f32[2,4,640], index: 1, kind: input, shape index: {}]   ;;  %s3458_s2 = inlined_call_operand.vmem [shape: f32[1,640], index: 2, kind: input, shape index: {}]   ;;  %s3459_s3 = inlined_call_operand.vmem [shape: f32[4,128], index: 3, kind: input, shape index: {}]   ;;  %s3460_s4 = inlined_call_operand.vmem [shape: f32[4,1], index: 4, kind: input, shape index: {}]   ;;  %s3461_s5 = inlined_call_operand.vmem [shape: f32[4,72], index: 5, kind: input, shape index: {}]   ;;  %s3462_s6 = inlined_call_operand.vmem [shape: f32[4,1], index: 6, kind: input, shape index: {}]   ;;  %s3463_s7 = inlined_call_operand.vmem [shape: f32[4,1], index: 7, kind: input, shape index: {}]   ;;  %s3464_s8 = inlined_call_operand.vmem [shape: f32[4,36], index: 8, kind: input, shape index: {}]   ;;  %s3465_s9 = inlined_call_operand.vmem [shape: f32[4,1], index: 9, kind: input, shape index: {}]   ;;  %s3466_s10 = inlined_call_operand.vmem [shape: f32[4,1], index: 10, kind: input, shape index: {}]   ;;  %s3467_s11 = inlined_call_operand.vmem [shape: f32[2,4,640], index: 11, kind: output, shape index: {}]  }
   0x1 LB: > { %s1884_s18 = sadd.s32 4294967295, %s2375_s17   ;;  %p1888_p0 = scmp.ge.s32.totalorder %s2375_s17, 1  ;;  %s2375_s17 = sphi %s2455_s17, %s21_s17  }
   0x2   : > { %p347_p1 = scmp.lt.s32.totalorder %s2375_s17, 3 }
   0x4   : > { %p348_p2 = pnand %p1888_p0, %p347_p1 }
   0x5   : > { %p392_p3 = scmp.lt.s32.totalorder (!%p348_p2), %s1884_s18, 1  ;;  %s2377_s23 = smov (!%p348_p2), 32  }
   0x6   : > { %351 = sbr.rel (%p348_p2) target bundleno = 1300 (0x514), region = 64  ;;  %s2378_s24 = smov (!%p348_p2), 30  }
   0x7   : > { %s2379_s25 = smov (!%p348_p2), 31   ;;  %s2380_s26 = smov (!%p348_p2), 29  }
   0x8   : > { %s2381_s27 = smov (!%p348_p2), 61   ;;  %s2382_s28 = smov (!%p348_p2), 62  }
   0x9   : > { %s2383_s29 = smov (!%p348_p2), 64   ;;  %s2384_s30 = smov (!%p348_p2), 63  }
   0xa   : > { %s2385_s12 = smov (!%p348_p2), 94   ;;  %s2386_s13 = smov (!%p348_p2), 93  }
   0xb   : > { %s3517_s18 = smov (!%p392_p3, %s1884_s18), 1  ;;  %s2387_s14 = smov 96   ;;  %vm751_vm0 = vcmask 244736   ;;  %vm774_vm1 = vcmask 236544   ;;  %vm728_vm2 = vcmask 252928   ;;  %vm705_vm3 = vcmask 261120  }
   0xc   : > { %s1904_s19 = smul.u32 48, %s3517_s18  ;;  %s2388_s15 = smov 95   ;;  %vm659_vm4 = vcmask 506880   ;;  %vm682_vm5 = vcmask 498688   ;;  %vm3473_vm6 = vcmask 515072   ;;  %vm3475_vm7 = vcmask 523264  }
   0xd   : > { %s2389_s16 = smov 126   ;;  %s2391_s20 = smov 127   ;;  %vm567_vm8 = vcmask 769024   ;;  %vm590_vm9 = vcmask 760832   ;;  %vm415_vm10 = vcmask 785408   ;;  %vm3474_vm11 = vcmask 777216  }
   0xe   : > { %s2469_s22 = scalar_lea.vmem %s3456_s0, %s1904_s19  ;;  %s2390_s19 = smov 125   ;;  %vm3472_vm12 = vcmask 1031168   ;;  %vm499_vm13 = vcmask 1022976   ;;  %vm3468_vm14 = vcmask 1039360  }
   0xf   : > { %v2472_v0 = vld [vmem:[%s2469_s22 + $0x10] sm:$0xff]  ;;  %v2475_v1 = vld [vmem:[%s2469_s22 + $0x18] sm:$0xff]  ;;  %v2478_v2 = vld [vmem:[%s2469_s22] sm:$0xff] }
  0x10   : > { %v1942_v3 = vpack.i.bf16 %v2475_v1, %v2472_v0  ;;  %v2483_v4 = vld [vmem:[%s2469_s22 + $0x8] sm:$0xff]  ;;  %v2507_v6 = vld [vmem:[%s2469_s22 + $0x20] sm:$0xff] }
  0x11   : > { %v2487_v5 = vpack.i.bf16 %v2483_v4, %v2478_v2  ;;  %v2510_v7 = vld [vmem:[%s2469_s22 + $0x28] sm:$0xff] }
  0x12   : > { %1943 = vrot.lane.b32.xlu1 %v1942_v3, %s2377_s23  ;;  %1933 = vrot.lane.b32.xlu0 %v1942_v3, %s2378_s24  ;;  %v2012_v8 = vpack.i.bf16 %v2510_v7, %v2507_v6 }
  0x13   : > { %1953 = vrot.lane.b32.xlu2 %v2487_v5, %s2378_s24 }
  0x1a   : > { %1948 = vrot.lane.b32.xlu1 %v1942_v3, %s2379_s25  ;;  %1938 = vrot.lane.b32.xlu0 %v1942_v3, %s2380_s26 }
  0x1b   : > { %1958 = vrot.lane.b32.xlu2 %v2487_v5, %s2380_s26 }
  0x22   : > { %1968 = vrot.lane.b32.xlu1 %v1942_v3, %s2381_s27  ;;  %1963 = vrot.lane.b32.xlu0 %v1942_v3, %s2382_s28 }
  0x23   : > { %1973 = vrot.lane.b32.xlu2 %v2487_v5, %s2377_s23 }
  0x2a   : > { %1983 = vrot.lane.b32.xlu1 %v1942_v3, %s2383_s29  ;;  %1978 = vrot.lane.b32.xlu0 %v2487_v5, %s2379_s25 }
  0x2b   : > { %1988 = vrot.lane.b32.xlu2 %v1942_v3, %s2384_s30 }
  0x32   : > { %1998 = vrot.lane.b32.xlu1 %v2487_v5, %s2381_s27  ;;  %1993 = vrot.lane.b32.xlu0 %v2487_v5, %s2382_s28 }
  0x33   : > { %2003 = vrot.lane.b32.xlu2 %v1942_v3, %s2385_s12 }
  0x3a   : > { %2013 = vrot.lane.b32.xlu1 %v2012_v8, %s2378_s24  ;;  %2008 = vrot.lane.b32.xlu0 %v1942_v3, %s2386_s13 }
  0x3b   : > { %2018 = vrot.lane.b32.xlu2 %v2012_v8, %s2380_s26 }
  0x42   : > { %2028 = vrot.lane.b32.xlu1 %v2487_v5, %s2384_s30  ;;  %2023 = vrot.lane.b32.xlu0 %v2487_v5, %s2383_s29 }
  0x43   : > { %2033 = vrot.lane.b32.xlu2 %v1942_v3, %s2387_s14 }
  0x4a   : > { %2043 = vrot.lane.b32.xlu1 %v2012_v8, %s2377_s23  ;;  %2038 = vrot.lane.b32.xlu0 %v1942_v3, %s2388_s15  ;;  %s1905_s23 = smul.u32 20, %s3517_s18 }
  0x4b   : > { %2048 = vrot.lane.b32.xlu2 %v2012_v8, %s2379_s25 }
  0x4c   : > { %s2834_s26 = scalar_lea.vmem %s3457_s1, %s1905_s23 }
  0x52   : > { %2058 = vrot.lane.b32.xlu1 %v2487_v5, %s2386_s13  ;;  %2053 = vrot.lane.b32.xlu0 %v2487_v5, %s2385_s12 }
  0x53   : > { %2063 = vrot.lane.b32.xlu2 %v1942_v3, %s2389_s16 }
  0x5a   : > { %2073 = vrot.lane.b32.xlu1 %v2012_v8, %s2382_s28  ;;  %2068 = vrot.lane.b32.xlu0 %v1942_v3, %s2390_s19 }
  0x5b   : > { %2078 = vrot.lane.b32.xlu2 %v2012_v8, %s2381_s27 }
  0x62   : > { %2088 = vrot.lane.b32.xlu1 %v2487_v5, %s2388_s15  ;;  %2083 = vrot.lane.b32.xlu0 %v2487_v5, %s2387_s14 }
  0x63   : > { %2093 = vrot.lane.b32.xlu2 %v1942_v3, %s2391_s20 }
  0x6a   : > { %2103 = vrot.lane.b32.xlu1 %v2012_v8, %s2384_s30  ;;  %2098 = vrot.lane.b32.xlu0 %v2012_v8, %s2383_s29 }
  0x6b   : > { %2108 = vrot.lane.b32.xlu2 %v2487_v5, %s2389_s16 }
  0x6d   : > { %v1954_v9 = vpop.permute.xlu2 %1953 }
  0x6e   : > { %v1955_v10 = vunpack.i.l.bf16 %v1954_v9  ;;  %v1956_v11 = vunpack.i.h.bf16 %v1954_v9 }
  0x70   : > { %v752_v15 = vsel %vm751_vm0, %v1955_v10, %v1956_v11 }
  0x72   : > { %2118 = vrot.lane.b32.xlu1 %v2012_v8, %s2385_s12  ;;  %2113 = vrot.lane.b32.xlu0 %v2487_v5, %s2390_s19 }
  0x73   : > { %2123 = vrot.lane.b32.xlu2 %v2012_v8, %s2386_s13 }
  0x75   : > { %v1959_v12 = vpop.permute.xlu2 %1958 }
  0x76   : > { %v1961_v13 = vunpack.i.h.bf16 %v1959_v12  ;;  %v1960_v14 = vunpack.i.l.bf16 %v1959_v12 }
  0x78   : > { %v775_v16 = vsel %vm774_vm1, %v1960_v14, %v1961_v13 }
  0x79   : > { %v820_v17 = vpack.c.bf16 %v775_v16, %v752_v15 }
  0x7a   : > { %518 = vrot.lane.b32.xlu1 %v2507_v6, %s2387_s14  ;;  %2128 = vrot.lane.b32.xlu0 %v2487_v5, %s2391_s20 }
  0x7b   : > { %540 = vrot.lane.b32.xlu2 %v2507_v6, %s2388_s15  ;;  %832 = vmatpush.bf16.msra.mxu0 %v820_v17 }
  0x7d   : > { %v2552_v18 = vpop.permute.xlu2 %1973 }
  0x7e   : > { %v1975_v57 = vunpack.i.l.bf16 %v2552_v18  ;;  %v1976_v58 = vunpack.i.h.bf16 %v2552_v18 }
  0x82   : > { %495 = vrot.lane.b32.xlu1 %v2507_v6, %s2390_s19  ;;  %472 = vrot.lane.b32.xlu0 %v2507_v6, %s2389_s16 }
  0x83   : > { %449 = vrot.lane.b32.xlu2 %v2507_v6, %s2391_s20 }
  0x84   : > { %v2560_v19 = vpop.permute.xlu1 %1943  ;;  %v2562_v20 = vpop.permute.xlu0 %1933 }
  0x85   : > { %v2564_v21 = vpop.permute.xlu2 %1988  ;;  %v1936_v22 = vunpack.i.h.bf16 %v2562_v20  ;;  %v1935_v23 = vunpack.i.l.bf16 %v2562_v20  ;;  %v1946_v31 = vunpack.i.h.bf16 %v2560_v19  ;;  %v1945_v32 = vunpack.i.l.bf16 %v2560_v19 }
  0x86   : > { %v1991_v53 = vunpack.i.h.bf16 %v2564_v21  ;;  %v1990_v54 = vunpack.i.l.bf16 %v2564_v21 }
  0x87   : > { %v754_v33 = vsel %vm751_vm0, %v1935_v23, %v1936_v22  ;;  %v753_v35 = vsel %vm751_vm0, %v1956_v11, %v1935_v23  ;;  %v708_v40 = vsel %vm705_vm3, %v1945_v32, %v1946_v31  ;;  %v707_v9 = vsel %vm705_vm3, %v1976_v58, %v1945_v32 }
  0x88   : > { %v639_v61 = vsel %vm3473_vm6, %v1990_v54, %v1991_v53 }
  0x8a   : > { %542 = vrot.lane.b32.xlu1 %v2510_v7, %s2388_s15  ;;  %520 = vrot.lane.b32.xlu0 %v2510_v7, %s2387_s14 }
  0x8b   : > { %474 = vrot.lane.b32.xlu2 %v2510_v7, %s2389_s16 }
  0x8c   : > { %v2574_v24 = vpop.permute.xlu1 %1948  ;;  %v2576_v25 = vpop.permute.xlu0 %1938 }
  0x8d   : > { %v1951_v26 = vunpack.i.h.bf16 %v2574_v24  ;;  %v1950_v27 = vunpack.i.l.bf16 %v2574_v24  ;;  %v1941_v28 = vunpack.i.h.bf16 %v2576_v25  ;;  %v1940_v29 = vunpack.i.l.bf16 %v2576_v25  ;;  %v2582_v30 = vpop.permute.xlu2 %2003 }
  0x8f   : > { %v777_v34 = vsel %vm774_vm1, %v1940_v29, %v1941_v28  ;;  %v776_v36 = vsel %vm774_vm1, %v1961_v13, %v1940_v29  ;;  %v731_v39 = vsel %vm728_vm2, %v1950_v27, %v1951_v26 }
  0x90   : > { %v822_v37 = vpack.c.bf16 %v777_v34, %v754_v33  ;;  %v821_v38 = vpack.c.bf16 %v776_v36, %v753_v35  ;;  %v817_v43 = vpack.c.bf16 %v731_v39, %v708_v40  ;;  %v2005_v39 = vunpack.i.l.bf16 %v2582_v30 }
  0x92   : > { %858 = vmatpush.bf16.msra.mxu2 %v822_v37  ;;  %451 = vrot.lane.b32.xlu1 %v2510_v7, %s2391_s20 }
  0x93   : > { %497 = vrot.lane.b32.xlu0 %v2510_v7, %s2390_s19  ;;  %845 = vmatpush.bf16.msra.mxu1 %v821_v38  ;;  %v706_v7 = vsel %vm705_vm3, %v1975_v57, %v1976_v58  ;;  %v2006_v38 = vunpack.i.h.bf16 %v2582_v30  ;;  %s2393_s19 = smov 33  }
  0x94   : > { %v2604_v41 = vpop.permute.xlu1 %1968  ;;  %v2606_v42 = vpop.permute.xlu0 %1963 }
  0x95   : > { %v1971_v44 = vunpack.i.h.bf16 %v2604_v41  ;;  %v1970_v45 = vunpack.i.l.bf16 %v2604_v41  ;;  %v1966_v46 = vunpack.i.h.bf16 %v2606_v42  ;;  %v1965_v47 = vunpack.i.l.bf16 %v2606_v42  ;;  %v2612_v48 = vpop.permute.xlu2 %2018 }
  0x96   : > { %v2021_v49 = vunpack.i.h.bf16 %v2612_v48  ;;  %v2020_v50 = vunpack.i.l.bf16 %v2612_v48  ;;  %859 = vmatpush.bf16.msra.mxu2 %v817_v43 }
  0x97   : > { %v662_v51 = vsel %vm659_vm4, %v1965_v47, %v1966_v46  ;;  %v685_v52 = vsel %vm682_vm5, %v1970_v45, %v1971_v44 }
  0x98   : > { %v812_v55 = vpack.c.bf16 %v685_v52, %v662_v51  ;;  %v2625_v56 = vsel %vm774_vm1, %v2020_v50, %v2021_v49  ;;  %v570_v52 = vsel %vm567_vm8, %v2005_v39, %v2006_v38  ;;  %v778_v58 = vsel %vm774_vm1, %v1941_v28, %v2020_v50 }
  0x9a   : > { %860 = vmatpush.bf16.msra.mxu2 %v812_v55 }
  0x9c   : > { %v2629_v59 = vpop.permute.xlu1 %1983  ;;  %v1979_v60 = vpop.permute.xlu0 %1978 }
  0x9d   : > { %v1986_v62 = vunpack.i.h.bf16 %v2629_v59  ;;  %v1985_v63 = vunpack.i.l.bf16 %v2629_v59  ;;  %v1981_v3 = vunpack.i.h.bf16 %v1979_v60  ;;  %v1980_v5 = vunpack.i.l.bf16 %v1979_v60  ;;  %v2645_v15 = vpop.permute.xlu2 %2033 }
  0x9f   : > { %v729_v8 = vsel %vm728_vm2, %v1980_v5, %v1981_v3  ;;  %v730_v10 = vsel %vm728_vm2, %v1981_v3, %v1950_v27  ;;  %v616_v11 = vsel %vm3475_vm7, %v1985_v63, %v1986_v62 }
  0xa0   : > { %v815_v12 = vpack.c.bf16 %v729_v8, %v706_v7  ;;  %v816_v13 = vpack.c.bf16 %v730_v10, %v707_v9  ;;  %v807_v14 = vpack.c.bf16 %v639_v61, %v616_v11 }
  0xa2   : > { %833 = vmatpush.bf16.msra.mxu0 %v815_v12  ;;  %846 = vmatpush.bf16.msra.mxu1 %v816_v13 }
  0xa3   : > { %861 = vmatpush.bf16.msra.mxu2 %v807_v14 }
  0xa4   : > { %v1999_v16 = vpop.permute.xlu1 %1998  ;;  %v1994_v17 = vpop.permute.xlu0 %1993 }
  0xa5   : > { %v2001_v18 = vunpack.i.h.bf16 %v1999_v16  ;;  %v2000_v23 = vunpack.i.l.bf16 %v1999_v16  ;;  %v1996_v29 = vunpack.i.h.bf16 %v1994_v17  ;;  %v1995_v32 = vunpack.i.l.bf16 %v1994_v17  ;;  %v2049_v40 = vpop.permute.xlu2 %2048 }
  0xa6   : > { %v2051_v13 = vunpack.i.h.bf16 %v2049_v40  ;;  %v2036_v17 = vunpack.i.h.bf16 %v2645_v15 }
  0xa7   : > { %v660_v27 = vsel %vm659_vm4, %v1995_v32, %v1996_v29  ;;  %v683_v33 = vsel %vm682_vm5, %v2000_v23, %v2001_v18  ;;  %v661_v34 = vsel %vm659_vm4, %v1996_v29, %v1965_v47  ;;  %v684_v35 = vsel %vm682_vm5, %v2001_v18, %v1970_v45 }
  0xa8   : > { %v810_v36 = vpack.c.bf16 %v683_v33, %v660_v27  ;;  %v811_v37 = vpack.c.bf16 %v684_v35, %v661_v34  ;;  %v2035_v18 = vunpack.i.l.bf16 %v2645_v15  ;;  %v2050_v23 = vunpack.i.l.bf16 %v2049_v40 }
  0xaa   : > { %834 = vmatpush.bf16.msra.mxu0 %v810_v36  ;;  %847 = vmatpush.bf16.msra.mxu1 %v811_v37  ;;  %v524_v35 = vsel %vm415_vm10, %v2035_v18, %v2036_v17  ;;  %v732_v40 = vsel %vm728_vm2, %v1951_v26, %v2050_v23 }
  0xac   : > { %v2014_v43 = vpop.permute.xlu1 %2013  ;;  %v2653_v48 = vpop.permute.xlu0 %2008 }
  0xad   : > { %v2016_v49 = vunpack.i.h.bf16 %v2014_v43  ;;  %v2015_v51 = vunpack.i.l.bf16 %v2014_v43  ;;  %v2011_v47 = vunpack.i.h.bf16 %v2653_v48  ;;  %v2010_v45 = vunpack.i.l.bf16 %v2653_v48  ;;  %v2676_v11 = vpop.permute.xlu2 %2063 }
  0xaf   : > { %v593_v55 = vsel %vm590_vm9, %v2010_v45, %v2011_v47  ;;  %v755_v57 = vsel %vm751_vm0, %v1936_v22, %v2015_v51  ;;  %v2672_v60 = vsel %vm751_vm0, %v2015_v51, %v2016_v49 }
  0xb0   : > { %v802_v61 = vpack.c.bf16 %v593_v55, %v570_v52  ;;  %v823_v3 = vpack.c.bf16 %v778_v58, %v755_v57  ;;  %v824_v5 = vpack.c.bf16 %v2625_v56, %v2672_v60 }
  0xb2   : > { %862 = vmatpush.bf16.msra.mxu2 %v802_v61  ;;  %871 = vmatpush.bf16.msra.mxu3 %v823_v3 }
  0xb4   : > { %v2029_v7 = vpop.permute.xlu1 %2028  ;;  %v2024_v8 = vpop.permute.xlu0 %2023 }
  0xb5   : > { %v2031_v9 = vunpack.i.h.bf16 %v2029_v7  ;;  %v2030_v20 = vunpack.i.l.bf16 %v2029_v7  ;;  %v2026_v10 = vunpack.i.h.bf16 %v2024_v8  ;;  %v2025_v22 = vunpack.i.l.bf16 %v2024_v8  ;;  %v2712_v49 = vpop.permute.xlu2 %2078 }
  0xb7   : > { %v614_v25 = vsel %vm3475_vm7, %v2025_v22, %v2026_v10  ;;  %v637_v28 = vsel %vm3473_vm6, %v2030_v20, %v2031_v9  ;;  %v615_v50 = vsel %vm3475_vm7, %v2026_v10, %v1985_v63  ;;  %v638_v12 = vsel %vm3473_vm6, %v2031_v9, %v1990_v54 }
  0xb8   : > { %v805_v14 = vpack.c.bf16 %v637_v28, %v614_v25  ;;  %v806_v16 = vpack.c.bf16 %v638_v12, %v615_v50  ;;  %v2689_v63 = vsel %vm728_vm2, %v2050_v23, %v2051_v13  ;;  %v2066_v10 = vunpack.i.h.bf16 %v2676_v11 }
  0xb9   : > { %v2065_v22 = vunpack.i.l.bf16 %v2676_v11  ;;  %v2080_v28 = vunpack.i.l.bf16 %v2712_v49 }
  0xba   : > { %835 = vmatpush.bf16.msra.mxu0 %v805_v14  ;;  %848 = vmatpush.bf16.msra.mxu1 %v806_v16 }
  0xbb   : > { %v479_v23 = vsel %vm3472_vm12, %v2065_v22, %v2066_v10 }
  0xbc   : > { %v2044_v29 = vpop.permute.xlu1 %2043  ;;  %v2686_v32 = vpop.permute.xlu0 %2038 }
  0xbd   : > { %v2046_v27 = vunpack.i.h.bf16 %v2044_v29  ;;  %v2045_v54 = vunpack.i.l.bf16 %v2044_v29  ;;  %v2041_v33 = vunpack.i.h.bf16 %v2686_v32  ;;  %v2040_v34 = vunpack.i.l.bf16 %v2686_v32  ;;  %v2724_v25 = vpop.permute.xlu2 %2093 }
  0xbe   : > { %v2096_v50 = vunpack.i.h.bf16 %v2724_v25  ;;  %v2095_v12 = vunpack.i.l.bf16 %v2724_v25  ;;  %v2081_v32 = vunpack.i.h.bf16 %v2712_v49 }
  0xbf   : > { %v547_v36 = vsel %vm3474_vm11, %v2040_v34, %v2041_v33  ;;  %v709_v37 = vsel %vm705_vm3, %v1946_v31, %v2045_v54  ;;  %v2710_v43 = vsel %vm705_vm3, %v2045_v54, %v2046_v27  ;;  %v686_v54 = vsel %vm682_vm5, %v1971_v44, %v2080_v28 }
  0xc0   : > { %v797_v51 = vpack.c.bf16 %v547_v36, %v524_v35  ;;  %v818_v52 = vpack.c.bf16 %v732_v40, %v709_v37  ;;  %v819_v55 = vpack.c.bf16 %v2689_v63, %v2710_v43  ;;  %v456_v35 = vsel %vm3468_vm14, %v2095_v12, %v2096_v50 }
  0xc1   : > { %v787_v42 = vpack.c.bf16 %v456_v35, %v2472_v0  ;;  %v687_v56 = vsel %vm682_vm5, %v2080_v28, %v2081_v32 }
  0xc2   : > { %863 = vmatpush.bf16.msra.mxu2 %v797_v51  ;;  %872 = vmatpush.bf16.msra.mxu3 %v818_v52 }
  0xc4   : > { %v2059_v57 = vpop.permute.xlu1 %2058  ;;  %v2054_v19 = vpop.permute.xlu0 %2053 }
  0xc5   : > { %v2061_v58 = vunpack.i.h.bf16 %v2059_v57  ;;  %v2060_v31 = vunpack.i.l.bf16 %v2059_v57  ;;  %v2056_v61 = vunpack.i.h.bf16 %v2054_v19  ;;  %v2055_v24 = vunpack.i.l.bf16 %v2054_v19  ;;  %v2109_v51 = vpop.permute.xlu2 %2108 }
  0xc7   : > { %v568_v26 = vsel %vm567_vm8, %v2055_v24, %v2056_v61  ;;  %v591_v3 = vsel %vm590_vm9, %v2060_v31, %v2061_v58  ;;  %v569_v7 = vsel %vm567_vm8, %v2056_v61, %v2005_v39  ;;  %v592_v8 = vsel %vm590_vm9, %v2061_v58, %v2010_v45 }
  0xc8   : > { %v800_v9 = vpack.c.bf16 %v591_v3, %v568_v26  ;;  %v801_v20 = vpack.c.bf16 %v592_v8, %v569_v7 }
  0xca   : > { %836 = vmatpush.bf16.msra.mxu0 %v800_v9  ;;  %849 = vmatpush.bf16.msra.mxu1 %v801_v20 }
  0xcc   : > { %v2729_v39 = vpop.permute.xlu1 %2073  ;;  %v2731_v45 = vpop.permute.xlu0 %2068 }
  0xcd   : > { %v2075_v13 = vunpack.i.l.bf16 %v2729_v39  ;;  %v2071_v14 = vunpack.i.h.bf16 %v2731_v45  ;;  %v2070_v16 = vunpack.i.l.bf16 %v2731_v45 }
  0xcf   : > { %v502_v29 = vsel %vm499_vm13, %v2070_v16, %v2071_v14  ;;  %v663_v27 = vsel %vm659_vm4, %v1966_v46, %v2075_v13  ;;  %v423_v46 = vld [vmem:[%s3459_s3] sm:$0xf] }
  0xd0   : > { %v792_v36 = vpack.c.bf16 %v502_v29, %v479_v23  ;;  %v813_v37 = vpack.c.bf16 %v686_v54, %v663_v27  ;;  %v2763_v58 = vpack.c.bf16 %v423_v46, %v423_v46  ;;  %v2780_v23 = vpop.permute.xlu2 %2123  ;;  %v2111_v27 = vunpack.i.h.bf16 %v2109_v51 }
  0xd1   : > { %v2110_v54 = vunpack.i.l.bf16 %v2109_v51  ;;  %v2125_v35 = vunpack.i.l.bf16 %v2780_v23  ;;  %v2126_v49 = vunpack.i.h.bf16 %v2780_v23 }
  0xd2   : > { %864 = vmatpush.bf16.msra.mxu2 %v792_v36  ;;  %873 = vmatpush.bf16.msra.mxu3 %v813_v37  ;;  %v478_v21 = vsel %vm3472_vm12, %v2111_v27, %v2065_v22 }
  0xd3   : > { %v477_v46 = vsel %vm3472_vm12, %v2110_v54, %v2111_v27  ;;  %v594_v51 = vsel %vm590_vm9, %v2011_v47, %v2125_v35 }
  0xd4   : > { %v2089_v40 = vpop.permute.xlu1 %2088  ;;  %v2084_v41 = vpop.permute.xlu0 %2083 }
  0xd5   : > { %v2091_v44 = vunpack.i.h.bf16 %v2089_v40  ;;  %v2090_v52 = vunpack.i.l.bf16 %v2089_v40  ;;  %v2086_v57 = vunpack.i.h.bf16 %v2084_v41  ;;  %v2085_v19 = vunpack.i.l.bf16 %v2084_v41 }
  0xd6   : > { %865 = vmatpush.bf16.msra.mxu2 %v787_v42 }
  0xd7   : > { %v522_v31 = vsel %vm415_vm10, %v2085_v19, %v2086_v57  ;;  %v545_v61 = vsel %vm3474_vm11, %v2090_v52, %v2091_v44  ;;  %v523_v0 = vsel %vm415_vm10, %v2086_v57, %v2035_v18  ;;  %v546_v24 = vsel %vm3474_vm11, %v2091_v44, %v2040_v34 }
  0xd8   : > { %v795_v26 = vpack.c.bf16 %v545_v61, %v522_v31  ;;  %v796_v3 = vpack.c.bf16 %v546_v24, %v523_v0  ;;  %v2812_v57 = vpop.permute.xlu2 %540  ;;  %v913_v24 = vld [vmem:[%s2834_s26] sm:$0xff] }
  0xd9   : > { %866 = vmatmul.bf16.vlgmr.msra.gmra.mxu2 %v2763_v58  ;;  %919 = vst [vmem:[#allocation1] ss:$2 sm:$0xff] %v913_v24 }
  0xda   : > { %837 = vmatpush.bf16.msra.mxu0 %v795_v26  ;;  %850 = vmatpush.bf16.msra.mxu1 %v796_v3  ;;  %v2392_v3 = vmov 0  }
  0xdb   : > { %2132 = vset.pattern.permute.xlu2 %v2392_v3  ;;  %2248 = vset.pattern.permute.xlu0 %v2392_v3 }
  0xdc   : > { %v2774_v7 = vpop.permute.xlu1 %2103  ;;  %v2776_v8 = vpop.permute.xlu0 %2098 }
  0xdd   : > { %v2105_v9 = vunpack.i.l.bf16 %v2774_v7  ;;  %v2100_v20 = vunpack.i.l.bf16 %v2776_v8  ;;  %v2106_v60 = vunpack.i.h.bf16 %v2774_v7  ;;  %v595_v7 = vsel %vm590_vm9, %v2125_v35, %v2126_v49 }
  0xde   : > { %vm3470_vm9 = vcmask 269312  }
  0xdf   : > { %v617_v18 = vsel %vm3475_vm7, %v1986_v62, %v2100_v20  ;;  %v640_v34 = vsel %vm3473_vm6, %v1991_v53, %v2105_v9  ;;  %v641_v25 = vsel %vm3473_vm6, %v2105_v9, %v2106_v60 }
  0xe0   : > { %v808_v29 = vpack.c.bf16 %v640_v34, %v617_v18  ;;  %v450_v26 = vpop.permute.xlu2 %449 }
  0xe1   : > { %v457_v11 = vsel %vm3468_vm14, %v2096_v50, %v450_v26  ;;  %v925_v50 = vld.sshfl [vmem:[#allocation1 + $0x8] sm:$0xff pattern:$0x75316420] }
  0xe2   : > { %874 = vmatpush.bf16.msra.mxu3 %v808_v29  ;;  %931 = vrot.lane.b32.xlu1 %v925_v50, %s2393_s19 }
  0xe4   : > { %v2793_v36 = vpop.permute.xlu1 %2118  ;;  %v2114_v37 = vpop.permute.xlu0 %2113 }
  0xe5   : > { %v2120_v42 = vunpack.i.l.bf16 %v2793_v36  ;;  %v2116_v59 = vunpack.i.h.bf16 %v2114_v37  ;;  %v2115_v62 = vunpack.i.l.bf16 %v2114_v37  ;;  %v2121_v28 = vunpack.i.h.bf16 %v2793_v36 }
  0xe7   : > { %v500_v53 = vsel %vm499_vm13, %v2115_v62, %v2116_v59  ;;  %v501_v40 = vsel %vm499_vm13, %v2116_v59, %v2070_v16  ;;  %v571_v41 = vsel %vm567_vm8, %v2006_v38, %v2120_v42  ;;  %v548_v38 = vsel %vm3474_vm11, %v2041_v33, %v2812_v57 }
  0xe8   : > { %v790_v44 = vpack.c.bf16 %v500_v53, %v477_v46  ;;  %v791_v52 = vpack.c.bf16 %v501_v40, %v478_v21  ;;  %v803_v22 = vpack.c.bf16 %v594_v51, %v571_v41  ;;  %v2076_v33 = vunpack.i.h.bf16 %v2729_v39  ;;  %v475_v27 = vpop.permute.xlu2 %474  ;;  %v914_v46 = vld [vmem:[%s2834_s26 + $0x8] sm:$0xff]  ;;  %v408_v21 = vld [vmem:[%s3458_s2] sm:$0x1f] }
  0xe9   : > { %921 = vst [vmem:[#allocation1 + $0x10] ss:$2 sm:$0xff] %v914_v46  ;;  %vm409_vm15 = vcmp.gt.f32.partialorder %v408_v21, 0.5 }
  0xea   : > { %838 = vmatpush.bf16.msra.mxu0 %v790_v44  ;;  %851 = vmatpush.bf16.msra.mxu1 %v791_v52  ;;  %v664_v45 = vsel %vm659_vm4, %v2075_v13, %v2076_v33  ;;  %v924_v13 = vld.sshfl [vmem:[#allocation1] sm:$0xff pattern:$0x75316420]  ;;  %v897_v40 = vsel %vm409_vm15, 1, %v2392_v3  ;;  %vm956_vm15 = vcmask 265216  }
  0xeb   : > { %875 = vmatpush.bf16.msra.mxu3 %v803_v22  ;;  %929 = vrot.lane.b32.xlu0 %v924_v13, %s2393_s19  ;;  %v900_v41 = vperm.slane %v897_v40, 2 }
  0xec   : > { %v2815_v16 = vpop.permute.xlu1 %518  ;;  %v2129_v30 = vpop.permute.xlu0 %2128 }
  0xed   : > { %v525_v48 = vsel %vm415_vm10, %v2036_v17, %v2815_v16  ;;  %v2131_v47 = vunpack.i.h.bf16 %v2129_v30  ;;  %v2130_v19 = vunpack.i.l.bf16 %v2129_v30  ;;  %vm2901_vm0 = vcmp.eq.s32.totalorder %v900_v41, 1 }
  0xee   : > { %v798_v31 = vpack.c.bf16 %v548_v38, %v525_v48  ;;  %v899_v30 = vperm.slane %v897_v40, 1 }
  0xef   : > { %v454_v61 = vsel %vm3468_vm14, %v2130_v19, %v2131_v47  ;;  %v455_v0 = vsel %vm3468_vm14, %v2131_v47, %v2095_v12  ;;  %v826_v12 = vld [vmem:[%s3460_s4] sm:$0xf] }
  0xf0   : > { %876 = vmatpush.bf16.msra.mxu3 %v798_v31  ;;  %v785_v15 = vpack.c.bf16 %v454_v61, %v2478_v2  ;;  %v786_v17 = vpack.c.bf16 %v455_v0, %v2483_v4  ;;  %829 = vperm.xlu2 %2132, %v826_v12   ;;  %v926_v53 = vld.sshfl [vmem:[#allocation1 + $0x10] sm:$0xff pattern:$0x75316420]  ;;  %vm2912_vm2 = vcmp.eq.s32.totalorder %v899_v30, 1 }
  0xf2   : > { %839 = vmatpush.bf16.msra.mxu0 %v785_v15  ;;  %852 = vmatpush.bf16.msra.mxu1 %v786_v17  ;;  %v915_v17 = vld [vmem:[%s2834_s26 + $0x10] sm:$0xf] }
  0xf3   : > { %923 = vst [vmem:[#allocation1 + $0x20] ss:$2 sm:$0xff] %v915_v17 }
  0xf4   : > { %v496_v2 = vpop.permute.xlu1 %495  ;;  %v473_v4 = vpop.permute.xlu0 %472 }
  0xf5   : > { %v503_v18 = vsel %vm499_vm13, %v2071_v14, %v496_v2  ;;  %v480_v34 = vsel %vm3472_vm12, %v2066_v10, %v473_v4  ;;  %840 = vmatmul.bf16.vlgmr.msra.gmra.mxu0 %v2763_v58  ;;  %853 = vmatmul.bf16.vlgmr.msra.gmra.mxu1 %v2763_v58  ;;  %v814_v10 = vpack.c.bf16 %v687_v56, %v664_v45 }
  0xf6   : > { %884 = vmatpush.bf16.msrb.mxu0 %v824_v5  ;;  %v2101_v5 = vunpack.i.h.bf16 %v2776_v8  ;;  %v793_v29 = vpack.c.bf16 %v503_v18, %v480_v34  ;;  %v788_v14 = vpack.c.bf16 %v457_v11, %v2475_v1  ;;  %v481_v35 = vsel %vm3472_vm12, %v473_v4, %v475_v27 }
  0xf8   : > { %877 = vmatpush.bf16.msra.mxu3 %v793_v29  ;;  %v618_v39 = vsel %vm3475_vm7, %v2100_v20, %v2101_v5  ;;  %933 = vrot.lane.b32.xlu2 %v926_v53, %s2393_s19  ;;  %v902_v29 = vperm.slane %v897_v40, 4 }
  0xf9   : > { %v809_v1 = vpack.c.bf16 %v641_v25, %v618_v39  ;;  %v2394_v39 = vmov 0.0  }
  0xfa   : > { %885 = vmatpush.bf16.msrb.mxu0 %v819_v55  ;;  %v572_v55 = vsel %vm567_vm8, %v2120_v42, %v2121_v28  ;;  %v928_v3 = vld.sshfl [vmem:[#allocation1 + $0x20] sm:$0xff pattern:$0x75316420]  ;;  %vm2932_vm5 = vcmp.eq.s32.totalorder %v902_v29, 1  ;;  %412 = vst [vmem:[#allocation2 + $0x10] sm:$0xff] %v2394_v39 }
  0xfb   : > { %v804_v8 = vpack.c.bf16 %v595_v7, %v572_v55  ;;  %410 = vst [vmem:[#allocation2] sm:$0xff] %v2394_v39 }
  0xfc   : > { %v521_v63 = vpop.permute.xlu0 %520  ;;  %878 = vmatpush.bf16.msra.mxu3 %v788_v14  ;;  %v543_v43 = vpop.permute.xlu1 %542  ;;  %411 = vst [vmem:[#allocation2 + $0x8] sm:$0xff] %v2394_v39 }
  0xfd   : > { %v549_v9 = vsel %vm3474_vm11, %v2812_v57, %v543_v43  ;;  %v526_v20 = vsel %vm415_vm10, %v2815_v16, %v521_v63  ;;  %v898_v16 = vperm.slane %v897_v40, 0  ;;  %413 = vst [vmem:[#allocation2 + $0x18] sm:$0xff] %v2394_v39 }
  0xfe   : > { %886 = vmatpush.bf16.msrb.mxu0 %v814_v10  ;;  %v799_v36 = vpack.c.bf16 %v549_v9, %v526_v20  ;;  %414 = vst [vmem:[#allocation2 + $0x20] sm:$0xff] %v2394_v39 }
  0xff   : > { %879 = vmatmul.bf16.vlgmr.msra.gmra.mxu3 %v2763_v58  ;;  %vm2908_vm1 = vcmp.eq.s32.totalorder %v898_v16, 1  ;;  %416 = vst.msk [vmem:[#allocation2 + $0x28] sm:$0xff] %vm415_vm10, %v2394_v39 }
 0x100   : > { %417 = vst [vmem:[#allocation3] sm:$0xff] %v2394_v39 }
 0x102   : > { %887 = vmatpush.bf16.msrb.mxu0 %v809_v1 }
 0x104   : > { %v452_v23 = vpop.permute.xlu1 %451 }
 0x105   : > { %v498_v54 = vpop.permute.xlu0 %497  ;;  %v458_v59 = vsel %vm3468_vm14, %v450_v26, %v452_v23  ;;  %v927_v26 = vld.sshfl [vmem:[#allocation1 + $0x18] sm:$0xff pattern:$0x75316420]  ;;  %vm988_vm14 = vcmask 1047820  }
 0x106   : > { %888 = vmatpush.bf16.msrb.mxu0 %v804_v8  ;;  %v504_v37 = vsel %vm499_vm13, %v496_v2, %v498_v54  ;;  %v789_v62 = vpack.c.bf16 %v458_v59, %v2507_v6  ;;  %v901_v2 = vperm.slane %v897_v40, 3  ;;  %vm3471_vm13 = vcmask 1043720  }
 0x107   : > { %v794_v42 = vpack.c.bf16 %v504_v37, %v481_v35 }
 0x108   : > { %vm2925_vm3 = vcmp.eq.s32.totalorder %v901_v2, 1 }
 0x10a   : > { %889 = vmatpush.bf16.msrb.mxu0 %v799_v36 }
 0x10e   : > { %890 = vmatpush.bf16.msrb.mxu0 %v794_v42 }
 0x112   : > { %891 = vmatpush.bf16.msrb.mxu0 %v789_v62 }
 0x115   : > { %892 = vmatmul.bf16.vlgmr.msrb.gmra.mxu0 %v2763_v58 }
 0x14a   : > { %v830_v51 = vpop.permute.xlu2 %829 }
 0x152   : > { %v934_v63 = vpop.permute.xlu2 %933 }
 0x154   : > { %v932_v25 = vpop.permute.xlu1 %931 }
 0x155   : > { %v941_v43 = vsel %vm3470_vm9, %v932_v25, %v934_v63 }
 0x156   : > { %953 = vst [vmem:[#allocation2 + $0x10] sm:$0xf] %v941_v43 }
 0x15c   : > { %v867_v44 = vpop.f32.mrf.mxu2 }
 0x15d   : > { %v868_v6 = vadd.f32 %v867_v44, %v830_v51  ;;  %v930_v50 = vpop.permute.xlu0 %929 }
 0x15e   : > { %v940_v13 = vsel %vm3470_vm9, %v930_v50, %v932_v25  ;;  %951 = vst.msk [vmem:[#allocation2] sm:$0xf] %vm3471_vm13, %v930_v50  ;;  %vm1211_vm13 = vcmask 588800  }
 0x15f   : > { %v910_v58 = vsel %vm2901_vm0, %v868_v6, 0.0  ;;  %952 = vst [vmem:[#allocation2 + $0x8] sm:$0xf] %v940_v13 }
 0x160   : > { %v965_v22 = vrot.slane %v910_v58, 4  ;;  %v1295_v58 = vld [vmem:[%s3462_s6] sm:$0xf] }
 0x162   : > { %972 = vrot.lane.b32.xlu2 %v965_v22, %s2393_s19 }
 0x164   : > { %v869_v57 = vpop.f32.mrf.mxu2 }
 0x16a   : > { %937 = vrot.lane.b32.xlu2 %v928_v3, %s2393_s19 }
 0x172   : > { %v841_v38 = vpop.f32.mrf.mxu0  ;;  %v854_v47 = vpop.f32.mrf.mxu1 }
 0x173   : > { %v842_v31 = vadd.f32 %v841_v38, %v830_v51  ;;  %v855_v61 = vadd.f32 %v854_v47, %v830_v51 }
 0x175   : > { %v908_v0 = vsel %vm2908_vm1, %v842_v31, 0.0  ;;  %v909_v15 = vsel %vm2912_vm2, %v855_v61, 0.0 }
 0x176   : > { %v963_v32 = vrot.slane %v908_v0, 4  ;;  %v964_v33 = vrot.slane %v909_v15, 4 }
 0x178   : > { %970 = vrot.lane.b32.xlu1 %v964_v33, %s2393_s19  ;;  %968 = vrot.lane.b32.xlu0 %v963_v32, %s2393_s19 }
 0x17a   : > { %v843_v12 = vpop.f32.mrf.mxu0  ;;  %v856_v24 = vpop.f32.mrf.mxu1 }
 0x180   : > { %935 = vrot.lane.b32.xlu0 %v927_v26, %s2393_s19 }
 0x182   : > { %v880_v4 = vpop.f32.mrf.mxu3 }
 0x183   : > { %v881_v34 = vadd.f32 %v880_v4, %v830_v51 }
 0x185   : > { %v911_v56 = vsel %vm2925_vm3, %v881_v34, 0.0 }
 0x186   : > { %v966_v60 = vrot.slane %v911_v56, 4 }
 0x188   : > { %974 = vrot.lane.b32.xlu1 %v966_v60, %s2393_s19 }
 0x18a   : > { %v882_v5 = vpop.f32.mrf.mxu3 }
 0x192   : > { %v893_v45 = vpop.f32.mrf.mxu0 }
 0x193   : > { %v894_v49 = vadd.f32 %v893_v45, %v830_v51 }
 0x195   : > { %v912_v10 = vsel %vm2932_vm5, %v894_v49, 0.0 }
 0x196   : > { %v967_v28 = vrot.slane %v912_v10, 4 }
 0x198   : > { %976 = vrot.lane.b32.xlu0 %v967_v28, %s2393_s19 }
 0x19a   : > { %v895_v14 = vpop.f32.mrf.mxu0 }
 0x1bc   : > { %v973_v1 = vpop.permute.xlu2 %972 }
 0x1c4   : > { %v938_v55 = vpop.permute.xlu2 %937 }
 0x1c5   : > { %957 = vst.msk [vmem:[#allocation2 + $0x28] sm:$0xf] %vm956_vm15, %v938_v55  ;;  %vm419_vm15 = vcmask 1043456  }
 0x1ea   : > { %v971_v7 = vpop.permute.xlu1 %970  ;;  %v969_v8 = vpop.permute.xlu0 %968 }
 0x1eb   : > { %v979_v9 = vsel %vm3470_vm9, %v971_v7, %v973_v1  ;;  %v978_v20 = vsel %vm3470_vm9, %v969_v8, %v971_v7  ;;  %989 = vst.msk [vmem:[#allocation2] sm:$0xf0] %vm988_vm14, %v969_v8  ;;  %vm3469_vm14 = vcmask 269316  }
 0x1ec   : > { %991 = vst [vmem:[#allocation2 + $0x10] sm:$0xf0] %v979_v9 }
 0x1ed   : > { %990 = vst [vmem:[#allocation2 + $0x8] sm:$0xf0] %v978_v20 }
 0x1f2   : > { %v936_v27 = vpop.permute.xlu0 %935  ;;  %v2952_v54 = vld [vmem:[#allocation2] sm:$0xff] }
 0x1f3   : > { %v942_v36 = vsel %vm3470_vm9, %v934_v63, %v936_v27  ;;  %1009 = vrot.lane.b32.xlu2 %v2952_v54, %s2391_s20  ;;  %v2957_v37 = vld [vmem:[#allocation2 + $0x10] sm:$0xff]  ;;  %v943_v23 = vsel %vm3470_vm9, %v936_v27, %v938_v55 }
 0x1f4   : > { %954 = vst [vmem:[#allocation2 + $0x18] sm:$0xf] %v942_v36  ;;  %v2960_v35 = vld [vmem:[#allocation2 + $0x8] sm:$0xff] }
 0x1f5   : > { %v2143_v42 = vpack.i.bf16 %v2957_v37, %v2960_v35  ;;  %955 = vst [vmem:[#allocation2 + $0x20] sm:$0xf] %v943_v23 }
 0x1f7   : > { %2144 = vrot.lane.b32.xlu0 %v2143_v42, %s2384_s30  ;;  %2134 = vrot.lane.b32.xlu1 %v2143_v42, %s2382_s28 }
 0x1fa   : > { %v975_v59 = vpop.permute.xlu1 %974 }
 0x1fb   : > { %v980_v62 = vsel %vm3470_vm9, %v973_v1, %v975_v59  ;;  %2139 = vrot.lane.b32.xlu2 %v2143_v42, %s2383_s29 }
 0x1fc   : > { %992 = vst [vmem:[#allocation2 + $0x18] sm:$0xf0] %v980_v62 }
 0x1ff   : > { %2159 = vrot.lane.b32.xlu0 %v2143_v42, %s2385_s12 }
 0x203   : > { %2154 = vrot.lane.b32.xlu2 %v2143_v42, %s2388_s15  ;;  %v2970_v46 = vld [vmem:[#allocation2 + $0x18] sm:$0xff] }
 0x204   : > { %v2148_v21 = vpack.i.bf16 %v2970_v46, %v2952_v54 }
 0x206   : > { %2149 = vrot.lane.b32.xlu1 %v2148_v21, %s2382_s28 }
 0x207   : > { %2174 = vrot.lane.b32.xlu0 %v2143_v42, %s2389_s16 }
 0x20a   : > { %v977_v53 = vpop.permute.xlu0 %976 }
 0x20b   : > { %v981_v40 = vsel %vm3470_vm9, %v975_v59, %v977_v53  ;;  %995 = vst.msk [vmem:[#allocation2 + $0x28] sm:$0xf0] %vm3469_vm14, %v977_v53  ;;  %2169 = vrot.lane.b32.xlu2 %v2148_v21, %s2384_s30  ;;  %v1306_v53 = vld [vmem:[%s3463_s7] sm:$0xf]  ;;  %vm3486_vm14 = vcmask 1039360  }
 0x20c   : > { %993 = vst [vmem:[#allocation2 + $0x20] sm:$0xf0] %v981_v40  ;;  %vm3487_vm9 = vmmov %vm3486_vm14 }
 0x20e   : > { %2164 = vrot.lane.b32.xlu1 %v2148_v21, %s2383_s29 }
 0x20f   : > { %2189 = vrot.lane.b32.xlu0 %v2148_v21, %s2385_s12 }
 0x212   : > { %v1002_v51 = vld [vmem:[#allocation2 + $0x28] sm:$0xff] }
 0x213   : > { %2184 = vrot.lane.b32.xlu2 %v2148_v21, %s2388_s15  ;;  %v2984_v41 = vld [vmem:[#allocation2 + $0x20] sm:$0xff] }
 0x214   : > { %v2213_v44 = vpack.i.bf16 %v1002_v51, %v2984_v41  ;;  %v2243_v6 = vpack.i.bf16 %v2984_v41, %v2970_v46 }
 0x216   : > { %2179 = vrot.lane.b32.xlu1 %v2143_v42, %s2387_s14 }
 0x217   : > { %2204 = vrot.lane.b32.xlu0 %v2148_v21, %s2387_s14 }
 0x21b   : > { %2199 = vrot.lane.b32.xlu2 %v2148_v21, %s2389_s16 }
 0x21e   : > { %2194 = vrot.lane.b32.xlu1 %v2143_v42, %s2391_s20 }
 0x21f   : > { %2214 = vrot.lane.b32.xlu0 %v2213_v44, %s2383_s29 }
 0x223   : > { %2224 = vrot.lane.b32.xlu2 %v2213_v44, %s2388_s15 }
 0x226   : > { %2209 = vrot.lane.b32.xlu1 %v2213_v44, %s2382_s28 }
 0x227   : > { %2229 = vrot.lane.b32.xlu0 %v2213_v44, %s2385_s12 }
 0x22b   : > { %2239 = vrot.lane.b32.xlu2 %v2213_v44, %s2387_s14 }
 0x22e   : > { %2219 = vrot.lane.b32.xlu1 %v2213_v44, %s2384_s30 }
 0x22f   : > { %2244 = vrot.lane.b32.xlu0 %v2243_v6, %s2391_s20 }
 0x233   : > { %1298 = vperm.xlu2 %2132, %v1295_v58  }
 0x236   : > { %2234 = vrot.lane.b32.xlu1 %v2213_v44, %s2389_s16 }
 0x237   : > { %1309 = vperm.xlu0 %2248, %v1306_v53  }
 0x23e   : > { %1019 = vrot.lane.b32.xlu1 %v1002_v51, %s2391_s20 }
 0x24d   : > { %v3003_v22 = vpop.permute.xlu2 %1009 }
 0x255   : > { %v2140_v57 = vpop.permute.xlu2 %2139 }
 0x256   : > { %v2142_v17 = vunpack.i.h.bf16 %v2140_v57  ;;  %v2141_v32 = vunpack.i.l.bf16 %v2140_v57 }
 0x258   : > { %v1132_v4 = vsel %vm3475_vm7, %v2141_v32, %v2142_v17 }
 0x25d   : > { %v3005_v16 = vpop.permute.xlu2 %2154 }
 0x25e   : > { %v2157_v26 = vunpack.i.h.bf16 %v3005_v16  ;;  %v2156_v3 = vunpack.i.l.bf16 %v3005_v16 }
 0x260   : > { %v1088_v29 = vsel %vm3474_vm11, %v2156_v3, %v2157_v26 }
 0x265   : > { %v3013_v34 = vpop.permute.xlu2 %2169 }
 0x266   : > { %v2172_v8 = vunpack.i.h.bf16 %v3013_v34  ;;  %v2171_v9 = vunpack.i.l.bf16 %v3013_v34 }
 0x269   : > { %v2135_v30 = vpop.permute.xlu1 %2134  ;;  %v2145_v38 = vpop.permute.xlu0 %2144 }
 0x26a   : > { %v2137_v47 = vunpack.i.h.bf16 %v2135_v30  ;;  %v2136_v31 = vunpack.i.l.bf16 %v2135_v30  ;;  %v2147_v61 = vunpack.i.h.bf16 %v2145_v38  ;;  %v2146_v0 = vunpack.i.l.bf16 %v2145_v38 }
 0x26c   : > { %v1176_v15 = vsel %vm659_vm4, %v2136_v31, %v2137_v47  ;;  %v1154_v24 = vsel %vm3473_vm6, %v2146_v0, %v2147_v61  ;;  %v1153_v62 = vsel %vm3473_vm6, %v2171_v9, %v2146_v0  ;;  %v1155_v21 = vsel %vm3473_vm6, %v2147_v61, %v2172_v8 }
 0x26d   : > { %v1206_v33 = vpack.c.bf16 %v1176_v15, %v1176_v15  ;;  %v1201_v5 = vpack.c.bf16 %v1154_v24, %v1132_v4  ;;  %v3025_v63 = vpop.permute.xlu2 %2184 }
 0x26e   : > { %v2187_v40 = vunpack.i.h.bf16 %v3025_v63  ;;  %v2186_v51 = vunpack.i.l.bf16 %v3025_v63 }
 0x26f   : > { %v1219_v12 = vsel %vm419_vm15, %v1206_v33, 0 }
 0x270   : > { %1246 = vmatpush.bf16.msrb.mxu2 %v1219_v12  ;;  %v1087_v61 = vsel %vm3474_vm11, %v2186_v51, %v2156_v3  ;;  %v1089_v0 = vsel %vm3474_vm11, %v2157_v26, %v2187_v40 }
 0x271   : > { %v2160_v2 = vpop.permute.xlu0 %2159 }
 0x272   : > { %v2162_v56 = vunpack.i.h.bf16 %v2160_v2  ;;  %v2161_v60 = vunpack.i.l.bf16 %v2160_v2 }
 0x274   : > { %1247 = vmatpush.bf16.msrb.mxu2 %v1201_v5  ;;  %v1110_v45 = vsel %vm567_vm8, %v2161_v60, %v2162_v56 }
 0x275   : > { %v1196_v49 = vpack.c.bf16 %v1110_v45, %v1088_v29  ;;  %v3056_v38 = vpop.permute.xlu2 %2199 }
 0x276   : > { %v2201_v33 = vunpack.i.l.bf16 %v3056_v38  ;;  %v2202_v4 = vunpack.i.h.bf16 %v3056_v38 }
 0x278   : > { %1248 = vmatpush.bf16.msrb.mxu2 %v1196_v49  ;;  %v3017_v10 = vpop.permute.xlu1 %2149 }
 0x279   : > { %v2152_v28 = vunpack.i.h.bf16 %v3017_v10  ;;  %v2151_v14 = vunpack.i.l.bf16 %v3017_v10  ;;  %v2175_v25 = vpop.permute.xlu0 %2174 }
 0x27b   : > { %v1175_v50 = vsel %vm659_vm4, %v2151_v14, %v2136_v31  ;;  %v1177_v13 = vsel %vm659_vm4, %v2137_v47, %v2152_v28  ;;  %v2177_v47 = vunpack.i.h.bf16 %v2175_v25  ;;  %v2176_v31 = vunpack.i.l.bf16 %v2175_v25 }
 0x27c   : > { %v1205_v43 = vpack.c.bf16 %v1175_v50, %v1175_v50  ;;  %v1207_v1 = vpack.c.bf16 %v1177_v13, %v1177_v13 }
 0x27d   : > { %v1043_v3 = vsel %vm3472_vm12, %v2201_v33, %v2176_v31  ;;  %v1044_v26 = vsel %vm3472_vm12, %v2176_v31, %v2177_v47  ;;  %v1045_v49 = vsel %vm3472_vm12, %v2177_v47, %v2202_v4 }
 0x27e   : > { %v1216_v55 = vsel %vm419_vm15, %v1205_v43, 0  ;;  %v1222_v7 = vsel %vm419_vm15, %v1207_v1, 0 }
 0x27f   : > { %1233 = vmatpush.bf16.msrb.mxu1 %v1216_v55  ;;  %1259 = vmatpush.bf16.msrb.mxu3 %v1222_v7  ;;  %v996_v7 = vld [vmem:[%s3461_s5] sm:$0xf] }
 0x280   : > { %v3031_v20 = vpop.permute.xlu1 %2164 }
 0x281   : > { %v2167_v27 = vunpack.i.h.bf16 %v3031_v20  ;;  %v2166_v36 = vunpack.i.l.bf16 %v3031_v20  ;;  %v3035_v23 = vpop.permute.xlu0 %2189 }
 0x282   : > { %v2192_v42 = vunpack.i.h.bf16 %v3035_v23  ;;  %v2191_v59 = vunpack.i.l.bf16 %v3035_v23 }
 0x283   : > { %v1131_v44 = vsel %vm3475_vm7, %v2166_v36, %v2141_v32  ;;  %v1133_v6 = vsel %vm3475_vm7, %v2142_v17, %v2167_v27 }
 0x284   : > { %v1200_v58 = vpack.c.bf16 %v1153_v62, %v1131_v44  ;;  %v1202_v57 = vpack.c.bf16 %v1155_v21, %v1133_v6  ;;  %v1109_v16 = vsel %vm567_vm8, %v2191_v59, %v2161_v60  ;;  %v1111_v30 = vsel %vm567_vm8, %v2162_v56, %v2192_v42 }
 0x285   : > { %v1195_v17 = vpack.c.bf16 %v1109_v16, %v1087_v61  ;;  %v1197_v32 = vpack.c.bf16 %v1111_v30, %v1089_v0  ;;  %v3086_v21 = vpack.c.bf16 %v996_v7, %v996_v7 }
 0x286   : > { %1234 = vmatpush.bf16.msrb.mxu1 %v1200_v58  ;;  %1260 = vmatpush.bf16.msrb.mxu3 %v1202_v57 }
 0x288   : > { %v2180_v15 = vpop.permute.xlu1 %2179 }
 0x289   : > { %v2182_v12 = vunpack.i.h.bf16 %v2180_v15  ;;  %v2181_v24 = vunpack.i.l.bf16 %v2180_v15  ;;  %v3063_v2 = vpop.permute.xlu0 %2204 }
 0x28a   : > { %v2207_v56 = vunpack.i.h.bf16 %v3063_v2  ;;  %v2206_v60 = vunpack.i.l.bf16 %v3063_v2  ;;  %1235 = vmatpush.bf16.msrb.mxu1 %v1195_v17  ;;  %1261 = vmatpush.bf16.msrb.mxu3 %v1197_v32 }
 0x28b   : > { %v1066_v5 = vsel %vm415_vm10, %v2181_v24, %v2182_v12 }
 0x28c   : > { %v1065_v29 = vsel %vm415_vm10, %v2206_v60, %v2181_v24  ;;  %v1191_v45 = vpack.c.bf16 %v1066_v5, %v1044_v26  ;;  %v1067_v14 = vsel %vm415_vm10, %v2182_v12, %v2207_v56 }
 0x28d   : > { %v1190_v25 = vpack.c.bf16 %v1065_v29, %v1043_v3  ;;  %v1192_v50 = vpack.c.bf16 %v1067_v14, %v1045_v49 }
 0x28e   : > { %1249 = vmatpush.bf16.msrb.mxu2 %v1191_v45 }
 0x28f   : > { %1236 = vmatpush.bf16.msrb.mxu1 %v1190_v25  ;;  %1262 = vmatpush.bf16.msrb.mxu3 %v1192_v50 }
 0x290   : > { %v2195_v13 = vpop.permute.xlu1 %2194 }
 0x291   : > { %v2197_v43 = vunpack.i.h.bf16 %v2195_v13  ;;  %v2196_v1 = vunpack.i.l.bf16 %v2195_v13  ;;  %v2215_v55 = vpop.permute.xlu0 %2214 }
 0x292   : > { %v2217_v47 = vunpack.i.h.bf16 %v2215_v55  ;;  %v2216_v31 = vunpack.i.l.bf16 %v2215_v55 }
 0x293   : > { %v1021_v9 = vsel %vm3486_vm14, %v3003_v22, %v2196_v1  ;;  %v1022_v36 = vsel %vm3487_vm9, %v2196_v1, %v2197_v43  ;;  %v2225_v22 = vpop.permute.xlu2 %2224  ;;  %vm3488_vm14 = vmmov %vm3487_vm9 }
 0x294   : > { %v1185_v59 = vpack.c.bf16 %v1021_v9, %v2952_v54  ;;  %v1186_v62 = vpack.c.bf16 %v1022_v36, %v2960_v35  ;;  %v2226_v10 = vunpack.i.l.bf16 %v2225_v22  ;;  %v1134_v12 = vsel %vm3475_vm7, %v2167_v27, %v2216_v31 }
 0x295   : > { %v1135_v60 = vsel %vm3475_vm7, %v2216_v31, %v2217_v47  ;;  %v2227_v26 = vunpack.i.h.bf16 %v2225_v22 }
 0x296   : > { %1237 = vmatpush.bf16.msrb.mxu1 %v1185_v59  ;;  %1250 = vmatpush.bf16.msrb.mxu2 %v1186_v62  ;;  %v1090_v25 = vsel %vm3474_vm11, %v2187_v40, %v2226_v10 }
 0x298   : > { %v2210_v53 = vpop.permute.xlu1 %2209 }
 0x299   : > { %v2212_v51 = vunpack.i.h.bf16 %v2210_v53  ;;  %v2211_v44 = vunpack.i.l.bf16 %v2210_v53  ;;  %v2230_v6 = vpop.permute.xlu0 %2229  ;;  %1892 = vmatmul.msk.bf16.vlgmr.msrb.gmra.mxu1 %vm1211_vm13, %v3086_v21  ;;  %1893 = vmatmul.msk.bf16.vlgmr.msrb.gmra.mxu2 %vm1211_vm13, %v3086_v21 }
 0x29a   : > { %v2231_v0 = vunpack.i.l.bf16 %v2230_v6  ;;  %v2232_v33 = vunpack.i.h.bf16 %v2230_v6 }
 0x29b   : > { %v1178_v54 = vsel %vm659_vm4, %v2152_v28, %v2211_v44  ;;  %v1179_v35 = vsel %vm659_vm4, %v2211_v44, %v2212_v51  ;;  %v2240_v5 = vpop.permute.xlu2 %2239 }
 0x29c   : > { %v1208_v58 = vpack.c.bf16 %v1178_v54, %v1178_v54  ;;  %v1209_v57 = vpack.c.bf16 %v1179_v35, %v1179_v35  ;;  %v1112_v20 = vsel %vm567_vm8, %v2192_v42, %v2231_v0  ;;  %v1113_v34 = vsel %vm567_vm8, %v2231_v0, %v2232_v33 }
 0x29d   : > { %v2241_v27 = vunpack.i.l.bf16 %v2240_v5  ;;  %v1198_v13 = vpack.c.bf16 %v1112_v20, %v1090_v25 }
 0x29e   : > { %v1225_v16 = vsel %vm419_vm15, %v1208_v58, 0  ;;  %v1228_v30 = vsel %vm419_vm15, %v1209_v57, 0 }
 0x29f   : > { %1272 = vmatpush.bf16.msra.mxu1 %v1225_v16  ;;  %1285 = vmatpush.bf16.msra.mxu2 %v1228_v30  ;;  %v1068_v63 = vsel %vm415_vm10, %v2207_v56, %v2241_v27 }
 0x2a0   : > { %v2220_v61 = vpop.permute.xlu1 %2219 }
 0x2a1   : > { %v2222_v15 = vunpack.i.h.bf16 %v2220_v61  ;;  %v2221_v17 = vunpack.i.l.bf16 %v2220_v61  ;;  %v2245_v32 = vpop.permute.xlu0 %2244 }
 0x2a2   : > { %v2246_v28 = vunpack.i.l.bf16 %v2245_v32 }
 0x2a3   : > { %v1156_v24 = vsel %vm3473_vm6, %v2172_v8, %v2221_v17  ;;  %v1157_v3 = vsel %vm3473_vm6, %v2221_v17, %v2222_v15  ;;  %v2242_v8 = vunpack.i.h.bf16 %v2240_v5  ;;  %v1299_v56 = vpop.permute.xlu2 %1298 }
 0x2a4   : > { %v1023_v29 = vsel %vm3487_vm9, %v2197_v43, %v2246_v28  ;;  %v1203_v45 = vpack.c.bf16 %v1156_v24, %v1134_v12  ;;  %v1204_v49 = vpack.c.bf16 %v1157_v3, %v1135_v60  ;;  %v1091_v43 = vsel %vm3474_vm11, %v2226_v10, %v2227_v26 }
 0x2a5   : > { %v1187_v14 = vpack.c.bf16 %v1023_v29, %v2957_v37  ;;  %v2247_v37 = vunpack.i.h.bf16 %v2245_v32  ;;  %v1199_v55 = vpack.c.bf16 %v1113_v34, %v1091_v43  ;;  %v1069_v7 = vsel %vm415_vm10, %v2241_v27, %v2242_v8 }
 0x2a6   : > { %1273 = vmatpush.bf16.msra.mxu1 %v1203_v45  ;;  %1286 = vmatpush.bf16.msra.mxu2 %v1204_v49  ;;  %vm3490_vm11 = vcmask 269312  }
 0x2a7   : > { %1263 = vmatpush.bf16.msrb.mxu3 %v1187_v14  ;;  %v1024_v59 = vsel %vm3488_vm14, %v2246_v28, %v2247_v37  ;;  %vm3491_vm7 = vmmov %vm3490_vm11 }
 0x2a8   : > { %v2235_v50 = vpop.permute.xlu1 %2234  ;;  %v1188_v53 = vpack.c.bf16 %v1024_v59, %v2970_v46 }
 0x2a9   : > { %v2237_v1 = vunpack.i.h.bf16 %v2235_v50  ;;  %v2236_v23 = vunpack.i.l.bf16 %v2235_v50  ;;  %v1310_v44 = vpop.permute.xlu0 %1309 }
 0x2aa   : > { %1894 = vmatmul.msk.bf16.vlgmr.msrb.gmra.mxu3 %vm1211_vm13, %v3086_v21  ;;  %1274 = vmatpush.bf16.msra.mxu1 %v1198_v13 }
 0x2ab   : > { %1287 = vmatpush.bf16.msra.mxu2 %v1199_v55  ;;  %v1046_v42 = vsel %vm3472_vm12, %v2202_v4, %v2236_v23  ;;  %v1047_v40 = vsel %vm3472_vm12, %v2236_v23, %v2237_v1  ;;  %vm3489_vm12 = vcmask 1043720  }
 0x2ac   : > { %v1193_v9 = vpack.c.bf16 %v1068_v63, %v1046_v42  ;;  %v1194_v36 = vpack.c.bf16 %v1069_v7, %v1047_v40 }
 0x2ae   : > { %1275 = vmatpush.bf16.msra.mxu1 %v1193_v9 }
 0x2af   : > { %1288 = vmatpush.bf16.msra.mxu2 %v1194_v36 }
 0x2b0   : > { %v1020_v62 = vpop.permute.xlu1 %1019 }
 0x2b1   : > { %v1025_v38 = vsel %vm3487_vm9, %v2247_v37, %v1020_v62  ;;  %vm1353_vm9 = vcmask 1047556  }
 0x2b2   : > { %v1189_v4 = vpack.c.bf16 %v1025_v38, %v2984_v41  ;;  %1276 = vmatpush.bf16.msra.mxu1 %v1188_v53  ;;  %vm1354_vm6 = vmor %vm1353_vm9, %vm3489_vm12  ;;  %vm1691_vm12 = vcmask 1041408   ;;  %vm3495_vm9 = vcmask 515072  }
 0x2b4   : > { %1289 = vmatpush.bf16.msra.mxu2 %v1189_v4 }
 0x2b5   : > { %1895 = vmatmul.msk.bf16.vlgmr.msra.gmra.mxu1 %vm1211_vm13, %v3086_v21 }
 0x2b7   : > { %1896 = vmatmul.msk.bf16.vlgmr.msra.gmra.mxu2 %vm1211_vm13, %v3086_v21  ;;  %vm420_vm13 = vcmask 785412  }
 0x2b8   : > { %vm421_vm14 = vmor %vm420_vm13, %vm419_vm15  ;;  %vm3493_vm13 = vcmask 523264  }
 0x2b9   : > { %422 = vst.msk [vmem:[#allocation3 + $0x10] sm:$0xff] %vm421_vm14, %v2394_v39  ;;  %vm3494_vm14 = vcmask 777216  }
 0x316   : > { %v1239_v2 = vpop.f32.mrf.mxu1 }
 0x317   : > { %v1301_v51 = vmul.f32 %v1299_v56, %v1239_v2 }
 0x319   : > { %v1312_v54 = vadd.f32 %v1310_v44, %v1301_v51 }
 0x31b   : > { %v1317_v57 = vmax.f32 %v1312_v54, 0.0 }
 0x31c   : > { %v1252_v6 = vpop.f32.mrf.mxu2 }
 0x31d   : > { %v1302_v22 = vmul.f32 %v1299_v56, %v1252_v6  ;;  %v1322_v47 = vsel %vm2908_vm1, %v1317_v57, 0.0 }
 0x31e   : > { %v1241_v46 = vpop.f32.mrf.mxu1 }
 0x31f   : > { %v1313_v35 = vadd.f32 %v1310_v44, %v1302_v22 }
 0x321   : > { %v1318_v58 = vmax.f32 %v1313_v35, 0.0 }
 0x323   : > { %v1323_v41 = vsel %vm2912_vm2, %v1318_v58, 0.0 }
 0x324   : > { %v1332_v16 = vrot.slane %v1323_v41, 4  ;;  %v1254_v30 = vpop.f32.mrf.mxu2 }
 0x326   : > { %v1334_v21 = vsel %vm419_vm15, %v1322_v47, %v1332_v16 }
 0x327   : > { %1336 = vrot.lane.b32.xlu1 %v1334_v21, %s2393_s19 }
 0x32d   : > { %v1265_v31 = vpop.f32.mrf.mxu3 }
 0x32e   : > { %v1303_v61 = vmul.f32 %v1299_v56, %v1265_v31 }
 0x330   : > { %v1314_v15 = vadd.f32 %v1310_v44, %v1303_v61 }
 0x332   : > { %v1278_v0 = vpop.f32.mrf.mxu1  ;;  %v1319_v33 = vmax.f32 %v1314_v15, 0.0 }
 0x333   : > { %v1304_v17 = vmul.f32 %v1299_v56, %v1278_v0 }
 0x334   : > { %v1324_v5 = vsel %vm2901_vm0, %v1319_v33, 0.0 }
 0x335   : > { %v1315_v32 = vadd.f32 %v1310_v44, %v1304_v17  ;;  %v1267_v10 = vpop.f32.mrf.mxu3 }
 0x337   : > { %v1320_v28 = vmax.f32 %v1315_v32, 0.0 }
 0x339   : > { %v1325_v12 = vsel %vm2925_vm3, %v1320_v28, 0.0 }
 0x33a   : > { %v1333_v24 = vrot.slane %v1325_v12, 4  ;;  %v1291_v60 = vpop.f32.mrf.mxu2  ;;  %v1280_v3 = vpop.f32.mrf.mxu1 }
 0x33b   : > { %v1305_v26 = vmul.f32 %v1299_v56, %v1291_v60 }
 0x33c   : > { %v1335_v29 = vsel %vm419_vm15, %v1324_v5, %v1333_v24 }
 0x33d   : > { %v1316_v45 = vadd.f32 %v1310_v44, %v1305_v26  ;;  %1338 = vrot.lane.b32.xlu2 %v1335_v29, %s2393_s19 }
 0x33f   : > { %v1321_v49 = vmax.f32 %v1316_v45, 0.0 }
 0x341   : > { %v1326_v14 = vsel %vm2932_vm5, %v1321_v49, 0.0 }
 0x342   : > { %v1293_v20 = vpop.f32.mrf.mxu2  ;;  %1340 = vrot.lane.b32.xlu1 %v1326_v14, %s2393_s19  ;;  %s406_s19 = scalar_lea.vmem %s3467_s11, %s1905_s23 }
 0x397   : > { %v1339_v34 = vpop.permute.xlu2 %1338 }
 0x398   : > { %v1343_v27 = vrot.slane %v1339_v34, 4 }
 0x399   : > { %v1337_v8 = vpop.permute.xlu1 %1336 }
 0x39a   : > { %v1342_v25 = vrot.slane %v1337_v8, 4 }
 0x39c   : > { %v1345_v50 = vsel %vm3490_vm11, %v1342_v25, %v1337_v8  ;;  %v1346_v13 = vsel %vm419_vm15, %v1342_v25, %v1343_v27 }
 0x39d   : > { %v3155_v43 = vsel %vm3491_vm7, %v1346_v13, %v1339_v34  ;;  %1355 = vst.msk [vmem:[#allocation3] sm:$0xff] %vm1354_vm6, %v1345_v50  ;;  %vm3492_vm6 = vcmask 269316  }
 0x39e   : > { %1369 = vst [vmem:[#allocation1 + $0x10] ss:$2 sm:$0xff] %v3155_v43  ;;  %vm1357_vm7 = vmor %vm3492_vm6, %vm419_vm15  ;;  %vm3496_vm6 = vcmask 1031168  }
 0x3a4   : > { %v3158_v37 = vld [vmem:[#allocation3] sm:$0xff] }
 0x3a5   : > { %1367 = vst [vmem:[#allocation1] ss:$2 sm:$0xff] %v3158_v37  ;;  %v3161_v39 = vld.sshfl [vmem:[#allocation1 + $0x10] sm:$0xff pattern:$0x75316420] }
 0x3a6   : > { %v3163_v1 = vld.sshfl [vmem:[#allocation1 + $0x18] sm:$0xff pattern:$0x75316420] }
 0x3a7   : > { %1386 = vst [vmem:[#allocation1 + $0x11] ss:$2 sm:$0xff] %v3155_v43 }
 0x3ac   : > { %v3166_v23 = vld.sshfl [vmem:[#allocation1] sm:$0xff pattern:$0x75316420]  ;;  %v3168_v55 = vld.sshfl [vmem:[#allocation1 + $0x8] sm:$0xff pattern:$0x75316420] }
 0x3ad   : > { %1384 = vst [vmem:[#allocation1 + $0x1] ss:$2 sm:$0xff] %v3158_v37 }
 0x3ae   : > { %v3171_v42 = vld.sshfl [vmem:[#allocation1 + $0x10] sm:$0xff pattern:$0x75316420]  ;;  %v3173_v63 = vld.sshfl [vmem:[#allocation1 + $0x18] sm:$0xff pattern:$0x75316420] }
 0x3af   : > { %1419 = vst [vmem:[#allocation1 + $0x10] ss:$2 sm:$0xff] %v3155_v43  ;;  %v2324_v40 = vpack.i.bf16 %v3173_v63, %v3171_v42  ;;  %v1783_v42 = vld [vmem:[%s3466_s10] sm:$0xf] }
 0x3b0   : > { %v1772_v63 = vld [vmem:[%s3465_s9] sm:$0xf] }
 0x3b4   : > { %v1341_v7 = vpop.permute.xlu1 %1340  ;;  %v1389_v9 = vld.sshfl [vmem:[#allocation1] sm:$0xff pattern:$0x75316420]  ;;  %v1390_v36 = vld.sshfl [vmem:[#allocation1 + $0x8] sm:$0xff pattern:$0x75316420] }
 0x3b5   : > { %v1344_v59 = vrot.slane %v1341_v7, 4  ;;  %v2249_v62 = vpack.i.bf16 %v1390_v36, %v1389_v9  ;;  %1417 = vst [vmem:[#allocation1] ss:$2 sm:$0xff] %v3158_v37 }
 0x3b6   : > { %v3181_v53 = vld.sshfl [vmem:[#allocation1 + $0x10] sm:$0xff pattern:$0x75316420]  ;;  %v3183_v38 = vld.sshfl [vmem:[#allocation1 + $0x18] sm:$0xff pattern:$0x75316420] }
 0x3b7   : > { %v1348_v4 = vsel %vm419_vm15, %v1343_v27, %v1344_v59  ;;  %2250 = vrot.lane.b32.xlu1 %v2249_v62, %s2391_s20  ;;  %1453 = vst [vmem:[#allocation1 + $0x11] ss:$2 sm:$0xff] %v3155_v43  ;;  %v2329_v2 = vpack.i.bf16 %v3183_v38, %v3181_v53 }
 0x3b8   : > { %v1349_v56 = vsel %vm3490_vm11, %v1348_v4, %v1341_v7  ;;  %vm1687_vm11 = vcmask 293888  }
 0x3b9   : > { %1358 = vst.msk [vmem:[#allocation3 + $0x10] sm:$0xff] %vm1357_vm7, %v1349_v56  ;;  %vm3497_vm7 = vcmask 1039360  }
 0x3bc   : > { %v1422_v51 = vld.sshfl [vmem:[#allocation1] sm:$0xff pattern:$0x75316420]  ;;  %v1423_v44 = vld.sshfl [vmem:[#allocation1 + $0x8] sm:$0xff pattern:$0x75316420] }
 0x3bd   : > { %v2254_v6 = vpack.i.bf16 %v1423_v44, %v1422_v51  ;;  %1451 = vst [vmem:[#allocation1 + $0x1] ss:$2 sm:$0xff] %v3158_v37 }
 0x3be   : > { %v3192_v22 = vld.sshfl [vmem:[#allocation1 + $0x10] sm:$0xff pattern:$0x75316420]  ;;  %v3194_v54 = vld.sshfl [vmem:[#allocation1 + $0x18] sm:$0xff pattern:$0x75316420] }
 0x3bf   : > { %2255 = vrot.lane.b32.xlu2 %v2254_v6, %s2389_s16  ;;  %1486 = vst [vmem:[#allocation1 + $0x10] ss:$2 sm:$0xff] %v3155_v43  ;;  %v2334_v44 = vpack.i.bf16 %v3194_v54, %v3192_v22 }
 0x3c0   : > { %v1362_v46 = vld [vmem:[#allocation3 + $0x10] sm:$0xf] }
 0x3c1   : > { %1371 = vst [vmem:[#allocation1 + $0x20] ss:$2 sm:$0xff] %v1362_v46  ;;  %v3201_v30 = vld [vmem:[#allocation3 + $0x10] sm:$0xff] }
 0x3c4   : > { %v1456_v35 = vld.sshfl [vmem:[#allocation1] sm:$0xff pattern:$0x75316420]  ;;  %v1457_v58 = vld.sshfl [vmem:[#allocation1 + $0x8] sm:$0xff pattern:$0x75316420] }
 0x3c5   : > { %v2259_v57 = vpack.i.bf16 %v1457_v58, %v1456_v35  ;;  %1484 = vst [vmem:[#allocation1] ss:$2 sm:$0xff] %v3158_v37 }
 0x3c6   : > { %v1491_v41 = vld.sshfl [vmem:[#allocation1 + $0x10] sm:$0xff pattern:$0x75316420]  ;;  %v1492_v16 = vld.sshfl [vmem:[#allocation1 + $0x18] sm:$0xff pattern:$0x75316420] }
 0x3c7   : > { %2260 = vrot.lane.b32.xlu0 %v2259_v57, %s2387_s14  ;;  %1520 = vst [vmem:[#allocation1 + $0x11] ss:$2 sm:$0xff] %v3155_v43  ;;  %v2269_v24 = vpack.i.bf16 %v1492_v16, %v1491_v41 }
 0x3c8   : > { %v3203_v47 = vld.sshfl [vmem:[#allocation1 + $0x20] sm:$0xff pattern:$0x75316420] }
 0x3c9   : > { %1388 = vst [vmem:[#allocation1 + $0x21] ss:$2 sm:$0xff] %v3201_v30 }
 0x3cc   : > { %v1489_v21 = vld.sshfl [vmem:[#allocation1] sm:$0xff pattern:$0x75316420]  ;;  %v1490_v31 = vld.sshfl [vmem:[#allocation1 + $0x8] sm:$0xff pattern:$0x75316420] }
 0x3cd   : > { %v2264_v61 = vpack.i.bf16 %v1490_v31, %v1489_v21  ;;  %1518 = vst [vmem:[#allocation1 + $0x1] ss:$2 sm:$0xff] %v3158_v37 }
 0x3ce   : > { %v1525_v0 = vld.sshfl [vmem:[#allocation1 + $0x10] sm:$0xff pattern:$0x75316420]  ;;  %v1526_v15 = vld.sshfl [vmem:[#allocation1 + $0x18] sm:$0xff pattern:$0x75316420] }
 0x3cf   : > { %2265 = vrot.lane.b32.xlu0 %v2264_v61, %s2388_s15  ;;  %1553 = vst [vmem:[#allocation1 + $0x10] ss:$2 sm:$0xff] %v3155_v43  ;;  %v2279_v14 = vpack.i.bf16 %v1526_v15, %v1525_v0 }
 0x3d0   : > { %v3209_v17 = vld.sshfl [vmem:[#allocation1 + $0x20] sm:$0xff pattern:$0x75316420]  ;;  %v3211_v32 = vld.sshfl [vmem:[#allocation1 + $0x28] sm:$0xff pattern:$0x75316420] }
 0x3d1   : > { %1421 = vst [vmem:[#allocation1 + $0x20] ss:$2 sm:$0xff] %v3201_v30  ;;  %v2354_v10 = vpack.i.bf16 %v3211_v32, %v3209_v17 }
 0x3d4   : > { %v1523_v33 = vld.sshfl [vmem:[#allocation1] sm:$0xff pattern:$0x75316420]  ;;  %v1524_v28 = vld.sshfl [vmem:[#allocation1 + $0x8] sm:$0xff pattern:$0x75316420] }
 0x3d5   : > { %v2274_v12 = vpack.i.bf16 %v1524_v28, %v1523_v33  ;;  %1551 = vst [vmem:[#allocation1] ss:$2 sm:$0xff] %v3158_v37 }
 0x3d6   : > { %v1558_v60 = vld.sshfl [vmem:[#allocation1 + $0x10] sm:$0xff pattern:$0x75316420]  ;;  %v1559_v3 = vld.sshfl [vmem:[#allocation1 + $0x18] sm:$0xff pattern:$0x75316420] }
 0x3d7   : > { %2275 = vrot.lane.b32.xlu1 %v2274_v12, %s2385_s12  ;;  %2270 = vrot.lane.b32.xlu0 %v2269_v24, %s2388_s15  ;;  %1587 = vst [vmem:[#allocation1 + $0x11] ss:$2 sm:$0xff] %v3155_v43  ;;  %v2294_v7 = vpack.i.bf16 %v1559_v3, %v1558_v60 }
 0x3d8   : > { %v3220_v26 = vld.sshfl [vmem:[#allocation1 + $0x20] sm:$0xff pattern:$0x75316420]  ;;  %v1427_v5 = vld.sshfl [vmem:[#allocation1 + $0x28] sm:$0xff pattern:$0x75316420] }
 0x3d9   : > { %1455 = vst [vmem:[#allocation1 + $0x21] ss:$2 sm:$0xff] %v3201_v30  ;;  %v2359_v15 = vpack.i.bf16 %v1427_v5, %v3220_v26 }
 0x3dc   : > { %v1556_v29 = vld.sshfl [vmem:[#allocation1] sm:$0xff pattern:$0x75316420]  ;;  %v1557_v45 = vld.sshfl [vmem:[#allocation1 + $0x8] sm:$0xff pattern:$0x75316420] }
 0x3dd   : > { %v2289_v49 = vpack.i.bf16 %v1557_v45, %v1556_v29  ;;  %1585 = vst [vmem:[#allocation1 + $0x1] ss:$2 sm:$0xff] %v3158_v37 }
 0x3de   : > { %v1592_v20 = vld.sshfl [vmem:[#allocation1 + $0x10] sm:$0xff pattern:$0x75316420]  ;;  %v1593_v34 = vld.sshfl [vmem:[#allocation1 + $0x18] sm:$0xff pattern:$0x75316420] }
 0x3df   : > { %2290 = vrot.lane.b32.xlu2 %v2289_v49, %s2383_s29  ;;  %2280 = vrot.lane.b32.xlu1 %v2279_v14, %s2385_s12  ;;  %1620 = vst [vmem:[#allocation1 + $0x10] ss:$2 sm:$0xff] %v3155_v43  ;;  %v2304_v56 = vpack.i.bf16 %v1593_v34, %v1592_v20 }
 0x3e0   : > { %v1460_v8 = vld.sshfl [vmem:[#allocation1 + $0x20] sm:$0xff pattern:$0x75316420]  ;;  %v1461_v27 = vld.sshfl [vmem:[#allocation1 + $0x28] sm:$0xff pattern:$0x75316420] }
 0x3e1   : > { %1488 = vst [vmem:[#allocation1 + $0x20] ss:$2 sm:$0xff] %v3201_v30  ;;  %v2364_v33 = vpack.i.bf16 %v1461_v27, %v1460_v8 }
 0x3e4   : > { %v1590_v25 = vld.sshfl [vmem:[#allocation1] sm:$0xff pattern:$0x75316420]  ;;  %v1591_v50 = vld.sshfl [vmem:[#allocation1 + $0x8] sm:$0xff pattern:$0x75316420] }
 0x3e5   : > { %v2299_v13 = vpack.i.bf16 %v1591_v50, %v1590_v25  ;;  %1618 = vst [vmem:[#allocation1] ss:$2 sm:$0xff] %v3158_v37 }
 0x3e6   : > { %v1625_v46 = vld.sshfl [vmem:[#allocation1 + $0x10] sm:$0xff pattern:$0x75316420]  ;;  %v1626_v35 = vld.sshfl [vmem:[#allocation1 + $0x18] sm:$0xff pattern:$0x75316420] }
 0x3e7   : > { %2300 = vrot.lane.b32.xlu0 %v2299_v13, %s2384_s30  ;;  %2295 = vrot.lane.b32.xlu2 %v2294_v7, %s2383_s29  ;;  %v2339_v16 = vpack.i.bf16 %v1626_v35, %v1625_v46 }
 0x3e8   : > { %v1493_v9 = vld.sshfl [vmem:[#allocation1 + $0x20] sm:$0xff pattern:$0x75316420]  ;;  %v1494_v36 = vld.sshfl [vmem:[#allocation1 + $0x28] sm:$0xff pattern:$0x75316420] }
 0x3e9   : > { %v2284_v59 = vpack.i.bf16 %v1494_v36, %v1493_v9  ;;  %1522 = vst [vmem:[#allocation1 + $0x21] ss:$2 sm:$0xff] %v3201_v30 }
 0x3eb   : > { %2285 = vrot.lane.b32.xlu1 %v2284_v59, %s2388_s15 }
 0x3ec   : > { %v1623_v43 = vld.sshfl [vmem:[#allocation1] sm:$0xff pattern:$0x75316420]  ;;  %v1624_v62 = vld.sshfl [vmem:[#allocation1 + $0x8] sm:$0xff pattern:$0x75316420] }
 0x3ed   : > { %v2309_v4 = vpack.i.bf16 %v1624_v62, %v1623_v43 }
 0x3ef   : > { %2310 = vrot.lane.b32.xlu2 %v2309_v4, %s2382_s28  ;;  %2305 = vrot.lane.b32.xlu0 %v2304_v56, %s2384_s30 }
 0x3f0   : > { %v1527_v37 = vld.sshfl [vmem:[#allocation1 + $0x20] sm:$0xff pattern:$0x75316420]  ;;  %v1528_v51 = vld.sshfl [vmem:[#allocation1 + $0x28] sm:$0xff pattern:$0x75316420] }
 0x3f1   : > { %1555 = vst [vmem:[#allocation1 + $0x20] ss:$2 sm:$0xff] %v3201_v30  ;;  %v2314_v6 = vpack.i.bf16 %v1528_v51, %v1527_v37 }
 0x3f3   : > { %2335 = vrot.lane.b32.xlu1 %v2334_v44, %s2387_s14 }
 0x3f7   : > { %2315 = vrot.lane.b32.xlu2 %v2314_v6, %s2385_s12 }
 0x3f8   : > { %v1560_v58 = vld.sshfl [vmem:[#allocation1 + $0x20] sm:$0xff pattern:$0x75316420]  ;;  %v1561_v57 = vld.sshfl [vmem:[#allocation1 + $0x28] sm:$0xff pattern:$0x75316420] }
 0x3f9   : > { %v2319_v41 = vpack.i.bf16 %v1561_v57, %v1560_v58  ;;  %1589 = vst [vmem:[#allocation1 + $0x21] ss:$2 sm:$0xff] %v3201_v30 }
 0x3fb   : > { %2320 = vrot.lane.b32.xlu0 %v2319_v41, %s2383_s29  ;;  %2340 = vrot.lane.b32.xlu1 %v2339_v16, %s2382_s28 }
 0x3ff   : > { %2325 = vrot.lane.b32.xlu2 %v2324_v40, %s2391_s20 }
 0x400   : > { %v1594_v22 = vld.sshfl [vmem:[#allocation1 + $0x20] sm:$0xff pattern:$0x75316420]  ;;  %v1595_v54 = vld.sshfl [vmem:[#allocation1 + $0x28] sm:$0xff pattern:$0x75316420] }
 0x401   : > { %v2344_v21 = vpack.i.bf16 %v1595_v54, %v1594_v22  ;;  %1622 = vst [vmem:[#allocation1 + $0x20] ss:$2 sm:$0xff] %v3201_v30  ;;  %v1359_v22 = vld [vmem:[%s3464_s8] sm:$0xf] }
 0x403   : > { %2330 = vrot.lane.b32.xlu0 %v2329_v2, %s2389_s16  ;;  %2345 = vrot.lane.b32.xlu1 %v2344_v21, %s2384_s30 }
 0x408   : > { %v1627_v31 = vld.sshfl [vmem:[#allocation1 + $0x20] sm:$0xff pattern:$0x75316420]  ;;  %v1628_v61 = vld.sshfl [vmem:[#allocation1 + $0x28] sm:$0xff pattern:$0x75316420] }
 0x409   : > { %v2349_v0 = vpack.i.bf16 %v1628_v61, %v1627_v31  ;;  %v3330_v31 = vpack.c.bf16 %v1359_v22, %v1359_v22 }
 0x40b   : > { %2350 = vrot.lane.b32.xlu2 %v2349_v0, %s2382_s28  ;;  %2360 = vrot.lane.b32.xlu0 %v2359_v15, %s2389_s16 }
 0x40c   : > { %2365 = vrot.lane.b32.xlu1 %v2364_v33, %s2387_s14 }
 0x413   : > { %2355 = vrot.lane.b32.xlu2 %v2354_v10, %s2391_s20  ;;  %1786 = vperm.xlu0 %2248, %v1783_v42  }
 0x419   : > { %v3267_v40 = vpop.permute.xlu2 %2255 }
 0x41a   : > { %v2258_v50 = vunpack.i.h.bf16 %v3267_v40  ;;  %v2257_v13 = vunpack.i.l.bf16 %v3267_v40 }
 0x41b   : > { %1775 = vperm.xlu2 %2132, %v1772_v63  }
 0x41c   : > { %v1440_v58 = vsel %vm3496_vm6, %v2257_v13, %v2258_v50 }
 0x429   : > { %v3275_v30 = vpop.permute.xlu1 %2250 }
 0x42a   : > { %v2253_v7 = vunpack.i.h.bf16 %v3275_v30  ;;  %v2252_v36 = vunpack.i.l.bf16 %v3275_v30 }
 0x42c   : > { %v1407_v57 = vsel %vm3497_vm7, %v2252_v36, %v2253_v7  ;;  %vm3501_vm7 = vcmask 515072  }
 0x42d   : > { %v1651_v54 = vsel %vm419_vm15, %v3166_v23, %v1407_v57 }
 0x439   : > { %v3269_v53 = vpop.permute.xlu2 %2290  ;;  %v3271_v38 = vpop.permute.xlu0 %2260 }
 0x43a   : > { %v2263_v14 = vunpack.i.h.bf16 %v3271_v38  ;;  %v2262_v20 = vunpack.i.l.bf16 %v3271_v38  ;;  %v2293_v34 = vunpack.i.h.bf16 %v3269_v53  ;;  %v2292_v8 = vunpack.i.l.bf16 %v3269_v53 }
 0x43c   : > { %v1474_v4 = vsel %vm415_vm10, %v2262_v20, %v2263_v14  ;;  %v1574_v56 = vsel %vm3493_vm13, %v2292_v8, %v2293_v34 }
 0x43d   : > { %v1656_v16 = vsel %vm419_vm15, %v1440_v58, %v1474_v4 }
 0x43e   : > { %v1671_v21 = vpack.c.bf16 %v1656_v16, %v1651_v54 }
 0x441   : > { %v3273_v2 = vpop.permute.xlu2 %2295  ;;  %v3277_v28 = vpop.permute.xlu0 %2265 }
 0x442   : > { %v2268_v27 = vunpack.i.h.bf16 %v3277_v28  ;;  %v2267_v25 = vunpack.i.l.bf16 %v3277_v28  ;;  %v2297_v33 = vunpack.i.l.bf16 %v3273_v2  ;;  %v2298_v53 = vunpack.i.h.bf16 %v3273_v2 }
 0x444   : > { %v1507_v37 = vsel %vm3494_vm14, %v2267_v25, %v2268_v27  ;;  %v1575_v20 = vsel %vm3493_vm13, %v2293_v34, %v2297_v33  ;;  %vm3498_vm14 = vmmov %vm3493_vm13 }
 0x445   : > { %v1576_v13 = vsel %vm3498_vm14, %v2297_v33, %v2298_v53  ;;  %vm3502_vm13 = vmmov %vm3501_vm7  ;;  %vm3503_vm14 = vcmask 1039360  }
 0x449   : > { %v3279_v17 = vpop.permute.xlu2 %2310  ;;  %v3281_v32 = vpop.permute.xlu1 %2275 }
 0x44a   : > { %v2313_v10 = vunpack.i.h.bf16 %v3279_v17  ;;  %v2312_v12 = vunpack.i.l.bf16 %v3279_v17  ;;  %v3289_v26 = vpop.permute.xlu0 %2270  ;;  %v2278_v45 = vunpack.i.h.bf16 %v3281_v32  ;;  %v2277_v49 = vunpack.i.l.bf16 %v3281_v32 }
 0x44b   : > { %v2273_v23 = vunpack.i.h.bf16 %v3289_v26 }
 0x44c   : > { %v1641_v24 = vsel %vm659_vm4, %v2312_v12, %v2313_v10  ;;  %v1541_v59 = vsel %vm567_vm8, %v2277_v49, %v2278_v45 }
 0x44d   : > { %v1681_v60 = vpack.c.bf16 %v1641_v24, %v1641_v24  ;;  %v1661_v46 = vsel %vm419_vm15, %v1507_v37, %v1541_v59  ;;  %v2272_v24 = vunpack.i.l.bf16 %v3289_v26 }
 0x44f   : > { %v1693_v3 = vsel %vm1691_vm12, %v1681_v60, 0 }
 0x450   : > { %1712 = vmatpush.bf16.msra.mxu3 %v1693_v3 }
 0x451   : > { %v3291_v5 = vpop.permute.xlu2 %2315  ;;  %v3293_v29 = vpop.permute.xlu1 %2280 }
 0x452   : > { %v2283_v28 = vunpack.i.h.bf16 %v3293_v29  ;;  %v2282_v32 = vunpack.i.l.bf16 %v3293_v29  ;;  %v2318_v60 = vunpack.i.h.bf16 %v3291_v5  ;;  %v2317_v3 = vunpack.i.l.bf16 %v3291_v5 }
 0x454   : > { %v1542_v36 = vsel %vm567_vm8, %v2278_v45, %v2282_v32  ;;  %v1543_v5 = vsel %vm567_vm8, %v2282_v32, %v2283_v28  ;;  %v1545_v37 = vsel %vm567_vm8, %v2317_v3, %v2318_v60 }
 0x459   : > { %v2301_v9 = vpop.permute.xlu0 %2300  ;;  %v3314_v44 = vpop.permute.xlu2 %2325 }
 0x45a   : > { %v2303_v43 = vunpack.i.h.bf16 %v2301_v9  ;;  %v2302_v62 = vunpack.i.l.bf16 %v2301_v9  ;;  %v2328_v29 = vunpack.i.h.bf16 %v3314_v44  ;;  %v2327_v9 = vunpack.i.l.bf16 %v3314_v44 }
 0x45c   : > { %v1608_v51 = vsel %vm3495_vm9, %v2302_v62, %v2303_v43  ;;  %vm3499_vm9 = vcmask 777216  }
 0x45d   : > { %v2286_v6 = vpop.permute.xlu1 %2285  ;;  %v1666_v35 = vsel %vm419_vm15, %v1574_v56, %v1608_v51  ;;  %v1508_v62 = vsel %vm3499_vm9, %v2268_v27, %v2272_v24  ;;  %vm3500_vm6 = vmmov %vm3499_vm9  ;;  %v1544_v56 = vsel %vm567_vm8, %v2283_v28, %v2317_v3  ;;  %v1408_v27 = vsel %vm3503_vm14, %v2253_v7, %v2327_v9 }
 0x45e   : > { %v1676_v41 = vpack.c.bf16 %v1666_v35, %v1661_v46  ;;  %v2288_v59 = vunpack.i.h.bf16 %v2286_v6  ;;  %v2287_v34 = vunpack.i.l.bf16 %v2286_v6  ;;  %v1509_v4 = vsel %vm3500_vm6, %v2272_v24, %v2273_v23  ;;  %vm3504_vm9 = vmmov %vm3503_vm14 }
 0x45f   : > { %v1409_v6 = vsel %vm3504_vm9, %v2327_v9, %v2328_v29  ;;  %v1663_v16 = vsel %vm419_vm15, %v1509_v4, %v1543_v5  ;;  %vm3505_vm8 = vmmov %vm3500_vm6  ;;  %v1652_v60 = vsel %vm419_vm15, %v3168_v55, %v1408_v27  ;;  %vm3510_vm14 = vcmask 515072  }
 0x460   : > { %1713 = vmatpush.bf16.msra.mxu3 %v1676_v41  ;;  %v1662_v41 = vsel %vm419_vm15, %v1508_v62, %v1542_v36  ;;  %v1511_v22 = vsel %vm3500_vm6, %v2287_v34, %v2288_v59  ;;  %v1653_v3 = vsel %vm419_vm15, %v3161_v39, %v1409_v6  ;;  %vm3511_vm9 = vmmov %vm3510_vm14 }
 0x461   : > { %v3332_v61 = vpop.permute.xlu0 %2305  ;;  %v1665_v9 = vsel %vm419_vm15, %v1511_v22, %v1545_v37 }
 0x462   : > { %v2308_v8 = vunpack.i.h.bf16 %v3332_v61  ;;  %v2307_v25 = vunpack.i.l.bf16 %v3332_v61 }
 0x464   : > { %1714 = vmatpush.bf16.msra.mxu3 %v1671_v21  ;;  %v1609_v35 = vsel %vm3501_vm7, %v2303_v43, %v2307_v25  ;;  %v1610_v45 = vsel %vm3502_vm13, %v2307_v25, %v2308_v8  ;;  %v1510_v43 = vsel %vm3505_vm8, %v2273_v23, %v2287_v34  ;;  %vm3508_vm7 = vcmask 1031168  }
 0x465   : > { %v3334_v0 = vpop.permute.xlu1 %2335  ;;  %v2351_v15 = vpop.permute.xlu2 %2350  ;;  %v1668_v33 = vsel %vm419_vm15, %v1576_v13, %v1610_v45  ;;  %vm3509_vm13 = vmmov %vm3508_vm7  ;;  %vm3512_vm8 = vcmask 1039360  }
 0x466   : > { %v2353_v42 = vunpack.i.h.bf16 %v2351_v15  ;;  %v2352_v63 = vunpack.i.l.bf16 %v2351_v15  ;;  %v1667_v15 = vsel %vm419_vm15, %v1575_v20, %v1609_v35  ;;  %v2337_v28 = vunpack.i.l.bf16 %v3334_v0  ;;  %vm3513_vm6 = vmmov %vm3512_vm8 }
 0x467   : > { %1897 = vmatmul.msk.bf16.vlgmr.msra.gmra.mxu3 %vm1687_vm11, %v3330_v31  ;;  %v1677_v25 = vpack.c.bf16 %v1667_v15, %v1662_v41  ;;  %v1678_v13 = vpack.c.bf16 %v1668_v33, %v1663_v16 }
 0x468   : > { %v1645_v12 = vsel %vm659_vm4, %v2352_v63, %v2353_v42  ;;  %v2338_v42 = vunpack.i.h.bf16 %v3334_v0  ;;  %v1475_v55 = vsel %vm415_vm10, %v2263_v14, %v2337_v28 }
 0x469   : > { %v1685_v49 = vpack.c.bf16 %v1645_v12, %v1645_v12 }
 0x46a   : > { %v1476_v39 = vsel %vm415_vm10, %v2337_v28, %v2338_v42 }
 0x46b   : > { %v1705_v26 = vsel %vm1691_vm12, %v1685_v49, 0  ;;  %v1664_v49 = vsel %vm419_vm15, %v1510_v43, %v1544_v56 }
 0x46c   : > { %1764 = vmatpush.bf16.msrb.mxu2 %v1705_v26 }
 0x46d   : > { %v2321_v51 = vpop.permute.xlu0 %2320  ;;  %v2341_v46 = vpop.permute.xlu1 %2340 }
 0x46e   : > { %v2343_v58 = vunpack.i.h.bf16 %v2341_v46  ;;  %v2342_v57 = vunpack.i.l.bf16 %v2341_v46  ;;  %v2323_v32 = vunpack.i.h.bf16 %v2321_v51  ;;  %v2322_v12 = vunpack.i.l.bf16 %v2321_v51  ;;  %v2356_v4 = vpop.permute.xlu2 %2355 }
 0x46f   : > { %v2357_v61 = vunpack.i.l.bf16 %v2356_v4 }
 0x470   : > { %v1642_v54 = vsel %vm659_vm4, %v2313_v10, %v2342_v57  ;;  %v1643_v30 = vsel %vm659_vm4, %v2342_v57, %v2343_v58  ;;  %v1644_v23 = vsel %vm659_vm4, %v2343_v58, %v2352_v63  ;;  %vm3506_vm4 = vcmask 523264  }
 0x471   : > { %v1682_v21 = vpack.c.bf16 %v1642_v54, %v1642_v54  ;;  %v1683_v7 = vpack.c.bf16 %v1643_v30, %v1643_v30  ;;  %v1684_v24 = vpack.c.bf16 %v1644_v23, %v1644_v23  ;;  %v1577_v34 = vsel %vm3506_vm4, %v2298_v53, %v2322_v12 }
 0x472   : > { %v2358_v58 = vunpack.i.h.bf16 %v2356_v4  ;;  %v1410_v41 = vsel %vm3512_vm8, %v2328_v29, %v2357_v61 }
 0x473   : > { %v1696_v17 = vsel %vm1691_vm12, %v1682_v21, 0  ;;  %v1699_v10 = vsel %vm1691_vm12, %v1683_v7, 0  ;;  %v1702_v0 = vsel %vm1691_vm12, %v1684_v24, 0  ;;  %vm3507_vm12 = vmmov %vm3506_vm4  ;;  %v1654_v29 = vsel %vm419_vm15, %v3163_v1, %v1410_v41 }
 0x474   : > { %1725 = vmatpush.bf16.msra.mxu0 %v1696_v17  ;;  %1738 = vmatpush.bf16.msrb.mxu3 %v1699_v10  ;;  %v1578_v62 = vsel %vm3507_vm12, %v2322_v12, %v2323_v32  ;;  %v1411_v16 = vsel %vm3513_vm6, %v2357_v61, %v2358_v58  ;;  %vm3514_vm4 = vmmov %vm3508_vm7 }
 0x475   : > { %v2331_v20 = vpop.permute.xlu0 %2330  ;;  %v2346_v63 = vpop.permute.xlu1 %2345  ;;  %1751 = vmatpush.bf16.msrb.mxu1 %v1702_v0  ;;  %vm3515_vm12 = vmmov %vm3514_vm4  ;;  %v1655_v15 = vsel %vm419_vm15, %v3203_v47, %v1411_v16 }
 0x476   : > { %v2333_v26 = vunpack.i.h.bf16 %v2331_v20  ;;  %v2332_v36 = vunpack.i.l.bf16 %v2331_v20  ;;  %v2348_v5 = vunpack.i.h.bf16 %v2346_v63  ;;  %v2347_v59 = vunpack.i.l.bf16 %v2346_v63  ;;  %v1776_v23 = vpop.permute.xlu2 %1775 }
 0x478   : > { %v1441_v56 = vsel %vm3508_vm7, %v2258_v50, %v2332_v36  ;;  %v1442_v37 = vsel %vm3509_vm13, %v2332_v36, %v2333_v26  ;;  %v1611_v38 = vsel %vm3510_vm14, %v2308_v8, %v2347_v59  ;;  %v1612_v14 = vsel %vm3511_vm9, %v2347_v59, %v2348_v5  ;;  %1726 = vmatpush.bf16.msra.mxu0 %v1677_v25 }
 0x479   : > { %1739 = vmatpush.bf16.msrb.mxu3 %v1678_v13  ;;  %v1657_v2 = vsel %vm419_vm15, %v1441_v56, %v1475_v55  ;;  %v1658_v53 = vsel %vm419_vm15, %v1442_v37, %v1476_v39  ;;  %v1669_v51 = vsel %vm419_vm15, %v1577_v34, %v1611_v38  ;;  %v1670_v40 = vsel %vm419_vm15, %v1578_v62, %v1612_v14 }
 0x47a   : > { %v1672_v46 = vpack.c.bf16 %v1657_v2, %v1652_v60  ;;  %v1673_v50 = vpack.c.bf16 %v1658_v53, %v1653_v3  ;;  %v1679_v35 = vpack.c.bf16 %v1669_v51, %v1664_v49  ;;  %v1680_v45 = vpack.c.bf16 %v1670_v40, %v1665_v9 }
 0x47c   : > { %1727 = vmatpush.bf16.msra.mxu0 %v1672_v46  ;;  %1752 = vmatpush.bf16.msrb.mxu1 %v1679_v35 }
 0x47d   : > { %1740 = vmatpush.bf16.msrb.mxu3 %v1673_v50  ;;  %1765 = vmatpush.bf16.msrb.mxu2 %v1680_v45  ;;  %v2361_v8 = vpop.permute.xlu0 %2360 }
 0x47e   : > { %v2363_v57 = vunpack.i.h.bf16 %v2361_v8  ;;  %v2362_v27 = vunpack.i.l.bf16 %v2361_v8  ;;  %v2366_v6 = vpop.permute.xlu1 %2365 }
 0x47f   : > { %v2368_v43 = vunpack.i.h.bf16 %v2366_v6  ;;  %v2367_v22 = vunpack.i.l.bf16 %v2366_v6  ;;  %1898 = vmatmul.msk.bf16.vlgmr.msra.gmra.mxu0 %vm1687_vm11, %v3330_v31 }
 0x480   : > { %v1443_v54 = vsel %vm3514_vm4, %v2333_v26, %v2362_v27  ;;  %v1444_v30 = vsel %vm3515_vm12, %v2362_v27, %v2363_v57  ;;  %1899 = vmatmul.msk.bf16.vlgmr.msrb.gmra.mxu3 %vm1687_vm11, %v3330_v31 }
 0x481   : > { %v1477_v21 = vsel %vm415_vm10, %v2338_v42, %v2367_v22  ;;  %v1478_v44 = vsel %vm415_vm10, %v2367_v22, %v2368_v43 }
 0x482   : > { %v1659_v7 = vsel %vm419_vm15, %v1443_v54, %v1477_v21  ;;  %v1660_v33 = vsel %vm419_vm15, %v1444_v30, %v1478_v44 }
 0x483   : > { %v1674_v28 = vpack.c.bf16 %v1659_v7, %v1654_v29  ;;  %v1675_v32 = vpack.c.bf16 %v1660_v33, %v1655_v15 }
 0x485   : > { %1753 = vmatpush.bf16.msrb.mxu1 %v1674_v28  ;;  %1766 = vmatpush.bf16.msrb.mxu2 %v1675_v32  ;;  %v1787_v17 = vpop.permute.xlu0 %1786 }
 0x488   : > { %1900 = vmatmul.msk.bf16.vlgmr.msrb.gmra.mxu1 %vm1687_vm11, %v3330_v31  ;;  %1901 = vmatmul.msk.bf16.vlgmr.msrb.gmra.mxu2 %vm1687_vm11, %v3330_v31 }
 0x4ea   : > { %v1716_v42 = vpop.f32.mrf.mxu3 }
 0x4eb   : > { %v1778_v12 = vmul.f32 %v1776_v23, %v1716_v42 }
 0x4ed   : > { %v1789_v47 = vadd.f32 %v1787_v17, %v1778_v12 }
 0x4ef   : > { %v1794_v3 = vmax.f32 %v1789_v47, 0.0 }
 0x4f1   : > { %v1799_v31 = vsel %vm2908_vm1, %v1794_v3, 0.0 }
 0x4f2   : > { %v1718_v1 = vpop.f32.mrf.mxu3 }
 0x4fc   : > { %v1729_v10 = vpop.f32.mrf.mxu0 }
 0x4fd   : > { %v1779_v24 = vmul.f32 %v1776_v23, %v1729_v10 }
 0x4ff   : > { %v1790_v60 = vadd.f32 %v1787_v17, %v1779_v24 }
 0x501   : > { %v1795_v49 = vmax.f32 %v1790_v60, 0.0 }
 0x503   : > { %v1800_v0 = vsel %vm2912_vm2, %v1795_v49, 0.0  ;;  %v1742_v20 = vpop.f32.mrf.mxu3 }
 0x504   : > { %v1808_v63 = vrot.slane %v1800_v0, 4  ;;  %v1780_v25 = vmul.f32 %v1776_v23, %v1742_v20  ;;  %v1731_v13 = vpop.f32.mrf.mxu0 }
 0x505   : > { %v1755_v9 = vpop.f32.mrf.mxu1 }
 0x506   : > { %v1810_v26 = vsel %vm419_vm15, %v1799_v31, %v1808_v63  ;;  %v1791_v36 = vadd.f32 %v1787_v17, %v1780_v25  ;;  %v1781_v5 = vmul.f32 %v1776_v23, %v1755_v9 }
 0x507   : > { %1814 = vst [vmem:[%s406_s19] sm:$0xff] %v1810_v26 }
 0x508   : > { %v1792_v19 = vadd.f32 %v1787_v17, %v1781_v5  ;;  %v1796_v59 = vmax.f32 %v1791_v36, 0.0 }
 0x50a   : > { %v1797_v55 = vmax.f32 %v1792_v19, 0.0  ;;  %v1801_v48 = vsel %vm2901_vm0, %v1796_v59, 0.0 }
 0x50b   : > { %v1768_v39 = vpop.f32.mrf.mxu2  ;;  %v1744_v34 = vpop.f32.mrf.mxu3 }
 0x50c   : > { %v1802_v62 = vsel %vm2925_vm3, %v1797_v55, 0.0  ;;  %v1782_v4 = vmul.f32 %v1776_v23, %v1768_v39 }
 0x50d   : > { %v1809_v56 = vrot.slane %v1802_v62, 4  ;;  %v1757_v37 = vpop.f32.mrf.mxu1 }
 0x50e   : > { %v1793_v38 = vadd.f32 %v1787_v17, %v1782_v4 }
 0x50f   : > { %v1811_v14 = vsel %vm419_vm15, %v1801_v48, %v1809_v56 }
 0x510   : > { %v1798_v2 = vmax.f32 %v1793_v38, 0.0  ;;  %1815 = vst [vmem:[%s406_s19 + $0x8] sm:$0xff] %v1811_v14 }
 0x512   : > { %v1803_v53 = vsel %vm2932_vm5, %v1798_v2, 0.0 }
 0x513   : > { %1816 = vst [vmem:[%s406_s19 + $0x10] sm:$0xf] %v1803_v53  ;;  %v1770_v51 = vpop.f32.mrf.mxu2 }
 0x514 PF: > { %s21_s17 = sadd.s32 1, %s2375_s17  }
 0x515   : > { %p18_p4 = scmp.ge.s32.totalorder %s21_s17, 4  }
 0x517   :  { %20 = sbr.rel (!%p18_p4) target bundleno = 1 (0x1), region = 121 }

</bundles_post_ra>
